<compile_context>
chip_gen: v7x
topology: tpu7x:2x2x1
jax: 0.10.0
libtpu: 0.0.40
codegen_flags: <defaults>
</compile_context>

<pallas_src>
import jax
import jax.numpy as jnp
from jax import lax
from jax.experimental import pallas as pl
from jax.experimental.pallas import tpu as pltpu

MATMUL_DTYPE = jnp.float32   # flip to jnp.bfloat16 for higher MXU throughput at realistic shapes


def _full_spec(arr):
    nd = arr.ndim
    return pl.BlockSpec(arr.shape, lambda b, _nd=nd: (0,) * _nd)


def _cdiv(a, b):
    return -(-a // b)


# ----------------------- Fused variance-adaptor predictor kernel -----------------------

def _make_fused_adaptor_kernel(Bb, T, H, F, n_bins, matmul_dtype=jnp.float32, eps=1e-5):
    M = Bb * T  # batch rows folded into the matmul M-dim

    def mdot(a, b):
        return jnp.dot(a.astype(matmul_dtype), b.astype(matmul_dtype),
                       preferred_element_type=jnp.float32)

    def layer_norm(h, g, be):
        mu = jnp.mean(h, axis=-1, keepdims=True)
        var = jnp.mean(jnp.square(h - mu), axis=-1, keepdims=True)
        return (h - mu) * lax.rsqrt(var + eps) * g + be

    def kernel(ctl_ref, bl_ref,                       # SMEM: (2,) controls, (3,) head biases
               x_ref, mask_ref,
               w1dp_ref, b1dp_ref, w1e_ref, b1e_ref,
               g1_ref, be1_ref, w2_ref, b2_ref, g2_ref, be2_ref,
               wl_ref, bins_ref, emb_ref,
               preds_ref, xout_ref):
        x = x_ref[...].reshape(M, H)                  # (Bb,T,H) -> (M,H), minor dim unchanged
        padded = mask_ref[...].reshape(M, 1) > 0.0    # True at padded tokens

        # ---- hoisted, reused by every conv / embedding in this grid step ----
        tpos = lax.broadcasted_iota(jnp.int32, (M, 1), 0) % T
        keep_prev = (tpos != 0).astype(matmul_dtype)        # row is not the 1st token of its seq
        keep_next = (tpos != T - 1).astype(matmul_dtype)    # row is not the last token of its seq
        bin_cols = lax.broadcasted_iota(jnp.int32, (M, n_bins), 1)

        def conv_cat(v):
            # (M, C) -> (M, 3C): taps [x_{t-1}, x_t, x_{t+1}], zero-padded at each sequence's
            # edges (per-row masks, so nothing leaks across folded batch boundaries).
            v = v.astype(matmul_dtype)
            prev = pltpu.roll(v, shift=1, axis=0) * keep_prev
            nxt = pltpu.roll(v, shift=M - 1, axis=0) * keep_next
            return jnp.concatenate([prev, v, nxt], axis=-1)

        def conv2_block(h, k):
            h = mdot(conv_cat(h), w2_ref[k]) + b2_ref[k]
            h = jnp.maximum(h, 0.0)
            return layer_norm(h, g2_ref[k], be2_ref[k])      # dropout: identity (eval mode)

        def head(h, k):
            # (F -> 1) linear as a VPU multiply-reduce; exact masked_fill semantics.
            pred = jnp.sum(h * wl_ref[k], axis=-1, keepdims=True) + bl_ref[k]
            return jnp.where(padded, 0.0, pred)

        def embed(scaled, j):
            # torch.bucketize(v, bins, right=False) == #{ b : b < v }
            idx = jnp.sum((scaled > bins_ref[j]).astype(jnp.int32), axis=-1, keepdims=True)
            onehot = (idx == bin_cols).astype(matmul_dtype)
            return mdot(onehot, emb_ref[j])                  # (M, H)

        # duration + pitch consume the identical x: shared xcat, one fused (3H, 2F) matmul.
        xcat = conv_cat(x)                                               # (M, 3H), built once
        h_dp = jnp.maximum(mdot(xcat, w1dp_ref[...]) + b1dp_ref[...], 0.0)   # (M, 2F)
        h_d = layer_norm(h_dp[:, :F], g1_ref[0], be1_ref[0])
        h_p = layer_norm(h_dp[:, F:], g1_ref[1], be1_ref[1])

        d_pred = head(conv2_block(h_d, 0), 0)                # log-duration (on original x)
        p_pred = head(conv2_block(h_p, 1), 1) * ctl_ref[0]   # pitch prediction * p_control
        x2 = x + embed(p_pred, 0)                            # x += pitch embedding

        h_e = jnp.maximum(mdot(conv_cat(x2), w1e_ref[...]) + b1e_ref[...], 0.0)
        h_e = layer_norm(h_e, g1_ref[2], be1_ref[2])
        e_pred = head(conv2_block(h_e, 2), 2) * ctl_ref[1]   # energy prediction * e_control
        x3 = x2 + embed(e_pred, 1)                           # x += energy embedding

        preds_ref[...] = jnp.concatenate([d_pred, p_pred, e_pred], axis=-1).reshape(Bb, T, 3)
        xout_ref[...] = x3.reshape(Bb, T, H)

    return kernel


def _stack_adaptor_params(params):
    """Stack / fuse the 3 predictors' params (kernel_size=3 assumed, tap order prev/center/next)."""
    pd, pp, pe = params["duration"], params["pitch"], params["energy"]

    def fuse(w):                                   # (3, Cin, Cout) -> (3*Cin, Cout)
        k, cin, cout = w.shape
        return w.reshape(k * cin, cout)

    return {
        # duration + pitch conv1 fused along the output-channel axis: (3H, 2F)
        "W1DP": jnp.concatenate([fuse(pd["w1"]), fuse(pp["w1"])], axis=-1),
        "B1DP": jnp.concatenate([pd["b1"], pp["b1"]], axis=-1),
        "W1E": fuse(pe["w1"]), "B1E": pe["b1"],
        "G1": jnp.stack([pd["g1"], pp["g1"], pe["g1"]]),
        "BE1": jnp.stack([pd["be1"], pp["be1"], pe["be1"]]),
        "W2": jnp.stack([fuse(p["w2"]) for p in (pd, pp, pe)]),            # (3, 3F, F)
        "B2": jnp.stack([p["b2"] for p in (pd, pp, pe)]),
        "G2": jnp.stack([p["g2"] for p in (pd, pp, pe)]),
        "BE2": jnp.stack([p["be2"] for p in (pd, pp, pe)]),
        "WL": jnp.stack([p["wl"].reshape(1, -1) for p in (pd, pp, pe)]),   # (3, 1, F)
        "BL": jnp.stack([p["bl"].reshape(()) for p in (pd, pp, pe)]),      # (3,) -> SMEM
        "BINS": jnp.stack([params["pitch_bins"], params["energy_bins"]]),            # (2,1,n_bins-1)
        "EMB": jnp.stack([params["pitch_embedding"], params["energy_embedding"]]),   # (2,n_bins,H)
    }


def run_fused_predictors(x, mask_f, s, controls, batch_block=None,
                         vmem_budget_bytes=40 * 2**20):
    B, T, H = x.shape
    F = s["W2"].shape[-1]
    n_bins = s["EMB"].shape[1]
    tensor_inputs = [s["W1DP"], s["B1DP"], s["W1E"], s["B1E"],
                     s["G1"], s["BE1"], s["W2"], s["B2"], s["G2"], s["BE2"],
                     s["WL"], s["BINS"], s["EMB"]]
    weight_bytes = sum(int(a.size) * a.dtype.itemsize for a in tensor_inputs)
    ms = jnp.dtype(MATMUL_DTYPE).itemsize

    def est_bytes(bb):
        m = bb * T
        blocks = 2 * (m * H * 4 + m * 4 + m * 3 * 4 + m * H * 4)   # double-buffered I/O blocks
        inter = 2 * m * (3 * H * ms + 2 * F * 4 + 3 * F * ms + F * 4 + n_bins * ms + 2 * H * 4)
        return blocks + 2 * weight_bytes + inter

    if batch_block is None:
        bb = max(1, min(B, 256 // max(T, 1)))        # target ~256 MXU rows per step
        if B > 1:
            bb = min(bb, _cdiv(B, 2))                # keep >=2 grid steps for megacore / v7x 2-TC
    else:
        bb = max(1, min(int(batch_block), B))
    while bb > 1 and est_bytes(bb) > vmem_budget_bytes:
        bb //= 2

    nb = _cdiv(B, bb)
    b_pad = nb * bb
    x_in, mask_in = x, mask_f
    if b_pad != B:                                   # pad batch; padded rows fully masked
        x_in = jnp.concatenate([x, jnp.zeros((b_pad - B, T, H), x.dtype)], axis=0)
        mask_in = jnp.concatenate([mask_f, jnp.ones((b_pad - B, T, 1), mask_f.dtype)], axis=0)

    kernel = _make_fused_adaptor_kernel(bb, T, H, F, n_bins, matmul_dtype=MATMUL_DTYPE)
    smem_spec = pl.BlockSpec(memory_space=pltpu.MemorySpace.SMEM)
    in_specs = [smem_spec, smem_spec,
                pl.BlockSpec((bb, T, H), lambda i: (i, 0, 0)),
                pl.BlockSpec((bb, T, 1), lambda i: (i, 0, 0))]
    in_specs += [_full_spec(a) for a in tensor_inputs]

    out_shape = (jax.ShapeDtypeStruct((b_pad, T, 3), jnp.float32),   # [log_dur, pitch, energy]
                 jax.ShapeDtypeStruct((b_pad, T, H), jnp.float32))   # x + pitch_emb + energy_emb
    out_specs = (pl.BlockSpec((bb, T, 3), lambda i: (i, 0, 0)),
                 pl.BlockSpec((bb, T, H), lambda i: (i, 0, 0)))

    vmem_limit = int(min(max(2 * est_bytes(bb), 16 * 2**20), 64 * 2**20))
    preds, xout = pl.pallas_call(
        kernel, grid=(nb,),
        in_specs=in_specs, out_specs=out_specs, out_shape=out_shape,
        compiler_params=pltpu.CompilerParams(
            dimension_semantics=("parallel",), vmem_limit_bytes=vmem_limit),
    )(controls, s["BL"], x_in, mask_in, *tensor_inputs)
    return preds[:B], xout[:B]


# ------------------------------- Length regulator kernel -------------------------------

def _make_length_regulator_kernel(T, H, frame_block, matmul_dtype=jnp.float32):
    def kernel(x_ref, prev_ref, cum_ref, out_ref):
        x = x_ref[0]                                  # (T, H), already cast in the wrapper
        prev = prev_ref[0]                            # (1, T) exclusive cumsum of durations
        cum = cum_ref[0]                              # (1, T) inclusive cumsum of durations
        base = pl.program_id(1) * frame_block         # first frame index of this chunk
        frames = (base + lax.broadcasted_iota(jnp.int32, (frame_block, T), 0)
                  ).astype(jnp.float32)               # (frame_block, T)
        onehot = jnp.logical_and(frames >= prev, frames < cum).astype(matmul_dtype)
        out_ref[0] = jnp.dot(onehot, x, preferred_element_type=jnp.float32)  # pad rows -> 0
    return kernel


def run_length_regulator(x, prev, cum, max_len, frame_block=128,
                         vmem_budget_bytes=40 * 2**20):
    # TODO(synk): torch LengthRegulator returns variable-length sequences; output here is
    # statically padded/truncated to max_len frames (pad() semantics), use mel_mask downstream.
    B, T, H = x.shape
    ms = jnp.dtype(MATMUL_DTYPE).itemsize
    fb = max(8, (int(frame_block) // 8) * 8)          # MXU M-dim; keep a multiple of 8, >=128 ideal

    def est_bytes(f):
        return (2 * (T * H * ms + 2 * T * 4 + f * H * 4)   # double-buffered blocks
                + f * T * (ms + 8))                        # one-hot + frame-index temporaries

    while fb > 8 and est_bytes(fb) > vmem_budget_bytes:    # v7x: 64 MiB VMEM budget
        fb = max(8, ((fb // 2) // 8) * 8)

    n_chunks = _cdiv(max_len, fb)
    padded_len = n_chunks * fb                         # pad, compute, slice (no fb=max_len fallback)

    prev3 = prev.reshape(B, 1, T).astype(jnp.float32)
    cum3 = cum.reshape(B, 1, T).astype(jnp.float32)
    kernel = _make_length_regulator_kernel(T, H, fb, matmul_dtype=MATMUL_DTYPE)
    vmem_limit = int(min(max(3 * est_bytes(fb), 16 * 2**20), 64 * 2**20))

    out = pl.pallas_call(
        kernel, grid=(B, n_chunks),
        in_specs=[pl.BlockSpec((1, T, H), lambda b, f: (b, 0, 0)),
                  pl.BlockSpec((1, 1, T), lambda b, f: (b, 0, 0)),
                  pl.BlockSpec((1, 1, T), lambda b, f: (b, 0, 0))],
        out_specs=pl.BlockSpec((1, fb, H), lambda b, f: (b, f, 0)),
        out_shape=jax.ShapeDtypeStruct((B, padded_len, H), jnp.float32),
        compiler_params=pltpu.CompilerParams(
            dimension_semantics=("parallel", "parallel"), vmem_limit_bytes=vmem_limit),
    )(x.astype(MATMUL_DTYPE), prev3, cum3)             # x cast once here, not per chunk
    return out[:, :max_len]


# --------------------------------- Forward (glue) --------------------------------------

def variance_adaptor_forward(params, x, src_mask, max_len,
                             p_control=1.0, e_control=1.0, d_control=1.0,
                             batch_block=None, frame_block=128):
    """Inference path (pitch/energy/duration targets = None)."""
    B, T, H = x.shape
    mask_f = src_mask.astype(jnp.float32)[..., None]         # (B, T, 1), 1.0 where padded

    stacked = _stack_adaptor_params(params)
    controls = jnp.asarray([p_control, e_control], jnp.float32)   # runtime values (SMEM)

    preds, x_adapted = run_fused_predictors(x, mask_f, stacked, controls,
                                            batch_block=batch_block)
    log_duration_prediction = preds[..., 0]
    pitch_prediction = preds[..., 1]                          # already * p_control (in kernel)
    energy_prediction = preds[..., 2]                         # already * e_control (in kernel)

    # matches the module: round(exp(logd) - 1), then * d_control, then clamp(min=0)
    duration_rounded = jnp.maximum(
        jnp.round(jnp.exp(log_duration_prediction) - 1.0) * d_control, 0.0)
    # LengthRegulator.expand() truncates per-token counts with int(); mirror with floor.
    dur_frames = jnp.floor(duration_rounded)

    # duration cumsum hoisted out of the LR kernel: computed once here, not per frame chunk
    cum = jnp.cumsum(dur_frames, axis=1)
    prev = cum - dur_frames
    mel_len = cum[:, -1].astype(jnp.int32)

    x_out = run_length_regulator(x_adapted, prev, cum, max_len, frame_block=frame_block)
    mel_mask = lax.broadcasted_iota(jnp.int32, (B, max_len), 1) >= mel_len[:, None]

    return (x_out, pitch_prediction, energy_prediction, log_duration_prediction,
            duration_rounded, mel_len, mel_mask)


# ---------------------------------- Parameter init -------------------------------------

def init_params(key, H=32, F=32, K=3, n_bins=16):
    keys = jax.random.split(key, 8)

    def predictor_params(k, cin):
        ks = jax.random.split(k, 6)
        return {
            "w1": jax.random.normal(ks[0], (K, cin, F), jnp.float32) * 0.1,   # conv1d_1 (tap,Cin,Cout)
            "b1": jax.random.normal(ks[1], (1, F), jnp.float32) * 0.01,
            "g1": jnp.ones((1, F), jnp.float32),                              # LayerNorm default init
            "be1": jnp.zeros((1, F), jnp.float32),
            "w2": jax.random.normal(ks[2], (K, F, F), jnp.float32) * 0.1,     # conv1d_2
            "b2": jax.random.normal(ks[3], (1, F), jnp.float32) * 0.01,
            "g2": jnp.ones((1, F), jnp.float32),
            "be2": jnp.zeros((1, F), jnp.float32),
            "wl": jax.random.normal(ks[4], (F, 1), jnp.float32) * 0.1,        # linear_layer
            "bl": jax.random.normal(ks[5], (1, 1), jnp.float32) * 0.01,
        }

    params = {
        "duration": predictor_params(keys[0], H),
        "pitch": predictor_params(keys[1], H),
        "energy": predictor_params(keys[2], H),
        # synthetic stats.json replacement: pitch/energy in [-1, 1]
        "pitch_bins": jnp.linspace(-1.0, 1.0, n_bins - 1).reshape(1, n_bins - 1).astype(jnp.float32),
        "energy_bins": jnp.linspace(-1.0, 1.0, n_bins - 1).reshape(1, n_bins - 1).astype(jnp.float32),
        "pitch_embedding": jax.random.normal(keys[3], (n_bins, H), jnp.float32) * 0.1,
        "energy_embedding": jax.random.normal(keys[4], (n_bins, H), jnp.float32) * 0.1,
    }
    # bias the duration head so exp(log_dur)-1 rounds to nonzero frame counts
    params["duration"]["bl"] = jnp.array([[1.0]], jnp.float32)
    return params


if __name__ == "__main__":
    B, T, H, F, N_BINS, MAX_LEN = 4, 8, 32, 32, 16, 24
    key = jax.random.PRNGKey(0)
    kx, kp = jax.random.split(key)

    x = jax.random.normal(kx, (B, T, H), jnp.float32)
    lengths = jnp.array([T, T - 2, T - 1, T - 3], jnp.int32)   # a few padded positions per row
    src_mask = lax.broadcasted_iota(jnp.int32, (B, T), 1) >= lengths[:, None]

    params = init_params(kp, H=H, F=F, n_bins=N_BINS)
    outs = variance_adaptor_forward(params, x, src_mask, MAX_LEN,
                                    p_control=1.0, e_control=1.0, d_control=1.0,
                                    batch_block=2,            # 2 batch rows folded per grid step
                                    frame_block=128)          # >=128 MXU rows in the LR matmul
    outs = jax.block_until_ready(outs)

    (x_out, pitch_p, energy_p, log_dur_p, dur_rounded, mel_len, mel_mask) = outs
    assert x_out.shape == (B, MAX_LEN, H)
    assert pitch_p.shape == (B, T) and energy_p.shape == (B, T)
    assert log_dur_p.shape == (B, T) and dur_rounded.shape == (B, T)
    assert mel_len.shape == (B,) and mel_mask.shape == (B, MAX_LEN)
    print("KERNEL_OK")
</pallas_src>

<mosaic_0001>
module attributes {stable_mosaic.version = 11 : i64} {
  func.func @kernel(%arg0: i32, %arg1: memref<2xf32, #tpu.memory_space<smem>>, %arg2: memref<3xf32, #tpu.memory_space<smem>>, %arg3: memref<2x8x32xf32, #tpu.memory_space<vmem>>, %arg4: memref<2x8x1xf32, #tpu.memory_space<vmem>>, %arg5: memref<96x64xf32, #tpu.memory_space<vmem>>, %arg6: memref<1x64xf32, #tpu.memory_space<vmem>>, %arg7: memref<96x32xf32, #tpu.memory_space<vmem>>, %arg8: memref<1x32xf32, #tpu.memory_space<vmem>>, %arg9: memref<3x1x32xf32, #tpu.memory_space<vmem>>, %arg10: memref<3x1x32xf32, #tpu.memory_space<vmem>>, %arg11: memref<3x96x32xf32, #tpu.memory_space<vmem>>, %arg12: memref<3x1x32xf32, #tpu.memory_space<vmem>>, %arg13: memref<3x1x32xf32, #tpu.memory_space<vmem>>, %arg14: memref<3x1x32xf32, #tpu.memory_space<vmem>>, %arg15: memref<3x1x32xf32, #tpu.memory_space<vmem>>, %arg16: memref<2x1x15xf32, #tpu.memory_space<vmem>>, %arg17: memref<2x16x32xf32, #tpu.memory_space<vmem>>, %arg18: memref<2x8x3xf32, #tpu.memory_space<vmem>>, %arg19: memref<2x8x32xf32, #tpu.memory_space<vmem>>) attributes {dimension_semantics = [#tpu.dimension_semantics<parallel>], iteration_bounds = array<i64: 2>, scalar_prefetch = 0 : i64, scratch_operands = 0 : i64, tpu.core_type = #tpu.core_type<tc>, window_params = [{transform_indices = @transform_0, window_bounds = array<i64: 2>}, {transform_indices = @transform_1, window_bounds = array<i64: 3>}, {transform_indices = @transform_2, window_bounds = array<i64: 2, 8, 32>}, {transform_indices = @transform_3, window_bounds = array<i64: 2, 8, 1>}, {pipeline_mode = #tpu.pipeline_mode<synchronous>, transform_indices = @transform_4, window_bounds = array<i64: 96, 64>}, {pipeline_mode = #tpu.pipeline_mode<synchronous>, transform_indices = @transform_5, window_bounds = array<i64: 1, 64>}, {pipeline_mode = #tpu.pipeline_mode<synchronous>, transform_indices = @transform_6, window_bounds = array<i64: 96, 32>}, {pipeline_mode = #tpu.pipeline_mode<synchronous>, transform_indices = @transform_7, window_bounds = array<i64: 1, 32>}, {pipeline_mode = #tpu.pipeline_mode<synchronous>, transform_indices = @transform_8, window_bounds = array<i64: 3, 1, 32>}, {pipeline_mode = #tpu.pipeline_mode<synchronous>, transform_indices = @transform_9, window_bounds = array<i64: 3, 1, 32>}, {pipeline_mode = #tpu.pipeline_mode<synchronous>, transform_indices = @transform_10, window_bounds = array<i64: 3, 96, 32>}, {pipeline_mode = #tpu.pipeline_mode<synchronous>, transform_indices = @transform_11, window_bounds = array<i64: 3, 1, 32>}, {pipeline_mode = #tpu.pipeline_mode<synchronous>, transform_indices = @transform_12, window_bounds = array<i64: 3, 1, 32>}, {pipeline_mode = #tpu.pipeline_mode<synchronous>, transform_indices = @transform_13, window_bounds = array<i64: 3, 1, 32>}, {pipeline_mode = #tpu.pipeline_mode<synchronous>, transform_indices = @transform_14, window_bounds = array<i64: 3, 1, 32>}, {pipeline_mode = #tpu.pipeline_mode<synchronous>, transform_indices = @transform_15, window_bounds = array<i64: 2, 1, 15>}, {pipeline_mode = #tpu.pipeline_mode<synchronous>, transform_indices = @transform_16, window_bounds = array<i64: 2, 16, 32>}, {transform_indices = @transform_17, window_bounds = array<i64: 2, 8, 3>}, {transform_indices = @transform_18, window_bounds = array<i64: 2, 8, 32>}]} {
    %c0 = arith.constant 0 : index
    %c0_0 = arith.constant 0 : index
    %c0_1 = arith.constant 0 : index
    %0 = vector.load %arg3[%c0, %c0_0, %c0_1] : memref<2x8x32xf32, #tpu.memory_space<vmem>>, vector<2x8x32xf32>
    %1 = vector.shape_cast %0 : vector<2x8x32xf32> to vector<16x32xf32>
    %c0_2 = arith.constant 0 : index
    %c0_3 = arith.constant 0 : index
    %c0_4 = arith.constant 0 : index
    %2 = vector.load %arg4[%c0_2, %c0_3, %c0_4] : memref<2x8x1xf32, #tpu.memory_space<vmem>>, vector<2x8x1xf32>
    %3 = vector.shape_cast %2 : vector<2x8x1xf32> to vector<16x1xf32>
    %cst = arith.constant 0.000000e+00 : f32
    %4 = vector.broadcast %cst : f32 to vector<16x1xf32>
    %5 = arith.cmpf ogt, %3, %4 : vector<16x1xf32>
    %6 = tpu.iota {dimensions = array<i32: 0>} : vector<16x1xi32>
    %c8_i32 = arith.constant 8 : i32
    %c0_i32 = arith.constant 0 : i32
    %7 = arith.cmpi eq, %c8_i32, %c0_i32 : i32
    %c1_i32 = arith.constant 1 : i32
    %8 = arith.select %7, %c1_i32, %c8_i32 : i32
    %9 = vector.broadcast %8 : i32 to vector<16x1xi32>
    %10 = arith.remsi %6, %9 : vector<16x1xi32>
    %c0_i32_5 = arith.constant 0 : i32
    %11 = vector.broadcast %c0_i32_5 : i32 to vector<16x1xi32>
    %12 = arith.cmpi ne, %10, %11 : vector<16x1xi32>
    %c0_i32_6 = arith.constant 0 : i32
    %13 = vector.broadcast %c0_i32_6 : i32 to vector<16x1xi32>
    %14 = arith.cmpi slt, %10, %13 : vector<16x1xi32>
    %c0_i32_7 = arith.constant 0 : i32
    %15 = arith.cmpi slt, %8, %c0_i32_7 : i32
    %16 = vector.broadcast %15 : i1 to vector<16x1xi1>
    %17 = vector.broadcast %16 : vector<16x1xi1> to vector<16x1xi1>
    %18 = arith.xori %14, %17 : vector<16x1xi1>
    %19 = arith.andi %18, %12 : vector<16x1xi1>
    %20 = vector.broadcast %8 : i32 to vector<16x1xi32>
    %21 = arith.addi %10, %20 : vector<16x1xi32>
    %22 = arith.select %19, %21, %10 : vector<16x1xi1>, vector<16x1xi32>
    %c0_i32_8 = arith.constant 0 : i32
    %23 = vector.broadcast %c0_i32_8 : i32 to vector<16x1xi32>
    %24 = arith.cmpi ne, %22, %23 : vector<16x1xi32>
    %25 = arith.extui %24 : vector<16x1xi1> to vector<16x1xi32>
    %26 = arith.sitofp %25 : vector<16x1xi32> to vector<16x1xf32>
    %c7_i32 = arith.constant 7 : i32
    %27 = vector.broadcast %c7_i32 : i32 to vector<16x1xi32>
    %28 = arith.cmpi ne, %22, %27 : vector<16x1xi32>
    %29 = arith.extui %28 : vector<16x1xi1> to vector<16x1xi32>
    %30 = arith.sitofp %29 : vector<16x1xi32> to vector<16x1xf32>
    %31 = tpu.iota {dimensions = array<i32: 1>} : vector<16x16xi32>
    %c1_i32_9 = arith.constant 1 : i32
    %32 = tpu.dynamic_rotate %1 by %c1_i32_9 dim 0 : vector<16x32xf32>, i32 -> vector<16x32xf32>
    %33 = vector.broadcast %26 : vector<16x1xf32> to vector<16x32xf32>
    %34 = arith.mulf %32, %33 : vector<16x32xf32>
    %c15_i32 = arith.constant 15 : i32
    %35 = tpu.dynamic_rotate %1 by %c15_i32 dim 0 : vector<16x32xf32>, i32 -> vector<16x32xf32>
    %36 = vector.broadcast %30 : vector<16x1xf32> to vector<16x32xf32>
    %37 = arith.mulf %35, %36 : vector<16x32xf32>
    %38 = tpu.concatenate %34, %1, %37 in 1 : vector<16x32xf32>, vector<16x32xf32>, vector<16x32xf32> -> vector<16x96xf32>
    %c0_10 = arith.constant 0 : index
    %c0_11 = arith.constant 0 : index
    %39 = vector.load %arg5[%c0_10, %c0_11] : memref<96x64xf32, #tpu.memory_space<vmem>>, vector<96x64xf32>
    %cst_12 = arith.constant dense<0.000000e+00> : vector<16x64xf32>
    %40 = tpu.matmul %38, %39, %cst_12 {dimension_numbers = #tpu.dot_dimension_numbers<[1], [0], [0], [1], [0, 0, 1, 1], [], []>} : vector<16x96xf32>, vector<96x64xf32>, vector<16x64xf32> -> vector<16x64xf32>
    %c0_13 = arith.constant 0 : index
    %c0_14 = arith.constant 0 : index
    %41 = vector.load %arg6[%c0_13, %c0_14] : memref<1x64xf32, #tpu.memory_space<vmem>>, vector<1x64xf32>
    %42 = vector.broadcast %41 : vector<1x64xf32> to vector<16x64xf32>
    %43 = arith.addf %40, %42 : vector<16x64xf32>
    %cst_15 = arith.constant 0.000000e+00 : f32
    %44 = vector.broadcast %cst_15 : f32 to vector<16x64xf32>
    %45 = arith.maximumf %43, %44 : vector<16x64xf32>
    %46 = vector.extract_strided_slice %45 {offsets = [0, 0], sizes = [16, 32], strides = [1, 1]} : vector<16x64xf32> to vector<16x32xf32>
    %c0_16 = arith.constant 0 : index
    %c0_17 = arith.constant 0 : index
    %c0_18 = arith.constant 0 : index
    %47 = vector.load %arg9[%c0_16, %c0_17, %c0_18] : memref<3x1x32xf32, #tpu.memory_space<vmem>>, vector<1x1x32xf32>
    %48 = vector.shape_cast %47 : vector<1x1x32xf32> to vector<1x32xf32>
    %c0_19 = arith.constant 0 : index
    %c0_20 = arith.constant 0 : index
    %c0_21 = arith.constant 0 : index
    %49 = vector.load %arg10[%c0_19, %c0_20, %c0_21] : memref<3x1x32xf32, #tpu.memory_space<vmem>>, vector<1x1x32xf32>
    %50 = vector.shape_cast %49 : vector<1x1x32xf32> to vector<1x32xf32>
    %cst_22 = arith.constant dense<0.000000e+00> : vector<16xf32>
    %51 = vector.multi_reduction <add>, %46, %cst_22 [1] : vector<16x32xf32> to vector<16xf32>
    %52 = vector.shape_cast %51 : vector<16xf32> to vector<16x1xf32>
    %cst_23 = arith.constant 3.200000e+01 : f32
    %53 = vector.broadcast %cst_23 : f32 to vector<16x1xf32>
    %54 = arith.divf %52, %53 : vector<16x1xf32>
    %55 = vector.broadcast %54 : vector<16x1xf32> to vector<16x32xf32>
    %56 = arith.subf %46, %55 : vector<16x32xf32>
    %57 = arith.mulf %56, %56 : vector<16x32xf32>
    %cst_24 = arith.constant dense<0.000000e+00> : vector<16xf32>
    %58 = vector.multi_reduction <add>, %57, %cst_24 [1] : vector<16x32xf32> to vector<16xf32>
    %59 = vector.shape_cast %58 : vector<16xf32> to vector<16x1xf32>
    %cst_25 = arith.constant 3.200000e+01 : f32
    %60 = vector.broadcast %cst_25 : f32 to vector<16x1xf32>
    %61 = arith.divf %59, %60 : vector<16x1xf32>
    %62 = vector.broadcast %54 : vector<16x1xf32> to vector<16x32xf32>
    %63 = arith.subf %46, %62 : vector<16x32xf32>
    %cst_26 = arith.constant 9.99999974E-6 : f32
    %64 = vector.broadcast %cst_26 : f32 to vector<16x1xf32>
    %65 = arith.addf %61, %64 : vector<16x1xf32>
    %66 = math.rsqrt %65 : vector<16x1xf32>
    %67 = vector.broadcast %66 : vector<16x1xf32> to vector<16x32xf32>
    %68 = arith.mulf %63, %67 : vector<16x32xf32>
    %69 = vector.broadcast %48 : vector<1x32xf32> to vector<16x32xf32>
    %70 = arith.mulf %68, %69 : vector<16x32xf32>
    %71 = vector.broadcast %50 : vector<1x32xf32> to vector<16x32xf32>
    %72 = arith.addf %70, %71 : vector<16x32xf32>
    %73 = vector.extract_strided_slice %45 {offsets = [0, 32], sizes = [16, 32], strides = [1, 1]} : vector<16x64xf32> to vector<16x32xf32>
    %c1 = arith.constant 1 : index
    %c0_27 = arith.constant 0 : index
    %c0_28 = arith.constant 0 : index
    %74 = vector.load %arg9[%c1, %c0_27, %c0_28] : memref<3x1x32xf32, #tpu.memory_space<vmem>>, vector<1x1x32xf32>
    %75 = vector.shape_cast %74 : vector<1x1x32xf32> to vector<1x32xf32>
    %c1_29 = arith.constant 1 : index
    %c0_30 = arith.constant 0 : index
    %c0_31 = arith.constant 0 : index
    %76 = vector.load %arg10[%c1_29, %c0_30, %c0_31] : memref<3x1x32xf32, #tpu.memory_space<vmem>>, vector<1x1x32xf32>
    %77 = vector.shape_cast %76 : vector<1x1x32xf32> to vector<1x32xf32>
    %cst_32 = arith.constant dense<0.000000e+00> : vector<16xf32>
    %78 = vector.multi_reduction <add>, %73, %cst_32 [1] : vector<16x32xf32> to vector<16xf32>
    %79 = vector.shape_cast %78 : vector<16xf32> to vector<16x1xf32>
    %cst_33 = arith.constant 3.200000e+01 : f32
    %80 = vector.broadcast %cst_33 : f32 to vector<16x1xf32>
    %81 = arith.divf %79, %80 : vector<16x1xf32>
    %82 = vector.broadcast %81 : vector<16x1xf32> to vector<16x32xf32>
    %83 = arith.subf %73, %82 : vector<16x32xf32>
    %84 = arith.mulf %83, %83 : vector<16x32xf32>
    %cst_34 = arith.constant dense<0.000000e+00> : vector<16xf32>
    %85 = vector.multi_reduction <add>, %84, %cst_34 [1] : vector<16x32xf32> to vector<16xf32>
    %86 = vector.shape_cast %85 : vector<16xf32> to vector<16x1xf32>
    %cst_35 = arith.constant 3.200000e+01 : f32
    %87 = vector.broadcast %cst_35 : f32 to vector<16x1xf32>
    %88 = arith.divf %86, %87 : vector<16x1xf32>
    %89 = vector.broadcast %81 : vector<16x1xf32> to vector<16x32xf32>
    %90 = arith.subf %73, %89 : vector<16x32xf32>
    %cst_36 = arith.constant 9.99999974E-6 : f32
    %91 = vector.broadcast %cst_36 : f32 to vector<16x1xf32>
    %92 = arith.addf %88, %91 : vector<16x1xf32>
    %93 = math.rsqrt %92 : vector<16x1xf32>
    %94 = vector.broadcast %93 : vector<16x1xf32> to vector<16x32xf32>
    %95 = arith.mulf %90, %94 : vector<16x32xf32>
    %96 = vector.broadcast %75 : vector<1x32xf32> to vector<16x32xf32>
    %97 = arith.mulf %95, %96 : vector<16x32xf32>
    %98 = vector.broadcast %77 : vector<1x32xf32> to vector<16x32xf32>
    %99 = arith.addf %97, %98 : vector<16x32xf32>
    %c1_i32_37 = arith.constant 1 : i32
    %100 = tpu.dynamic_rotate %72 by %c1_i32_37 dim 0 : vector<16x32xf32>, i32 -> vector<16x32xf32>
    %101 = vector.broadcast %26 : vector<16x1xf32> to vector<16x32xf32>
    %102 = arith.mulf %100, %101 : vector<16x32xf32>
    %c15_i32_38 = arith.constant 15 : i32
    %103 = tpu.dynamic_rotate %72 by %c15_i32_38 dim 0 : vector<16x32xf32>, i32 -> vector<16x32xf32>
    %104 = vector.broadcast %30 : vector<16x1xf32> to vector<16x32xf32>
    %105 = arith.mulf %103, %104 : vector<16x32xf32>
    %106 = tpu.concatenate %102, %72, %105 in 1 : vector<16x32xf32>, vector<16x32xf32>, vector<16x32xf32> -> vector<16x96xf32>
    %c0_39 = arith.constant 0 : index
    %c0_40 = arith.constant 0 : index
    %c0_41 = arith.constant 0 : index
    %107 = vector.load %arg11[%c0_39, %c0_40, %c0_41] : memref<3x96x32xf32, #tpu.memory_space<vmem>>, vector<1x96x32xf32>
    %108 = vector.shape_cast %107 : vector<1x96x32xf32> to vector<96x32xf32>
    %cst_42 = arith.constant dense<0.000000e+00> : vector<16x32xf32>
    %109 = tpu.matmul %106, %108, %cst_42 {dimension_numbers = #tpu.dot_dimension_numbers<[1], [0], [0], [1], [0, 0, 1, 1], [], []>} : vector<16x96xf32>, vector<96x32xf32>, vector<16x32xf32> -> vector<16x32xf32>
    %c0_43 = arith.constant 0 : index
    %c0_44 = arith.constant 0 : index
    %c0_45 = arith.constant 0 : index
    %110 = vector.load %arg12[%c0_43, %c0_44, %c0_45] : memref<3x1x32xf32, #tpu.memory_space<vmem>>, vector<1x1x32xf32>
    %111 = vector.shape_cast %110 : vector<1x1x32xf32> to vector<1x32xf32>
    %112 = vector.broadcast %111 : vector<1x32xf32> to vector<16x32xf32>
    %113 = arith.addf %109, %112 : vector<16x32xf32>
    %cst_46 = arith.constant 0.000000e+00 : f32
    %114 = vector.broadcast %cst_46 : f32 to vector<16x32xf32>
    %115 = arith.maximumf %113, %114 : vector<16x32xf32>
    %c0_47 = arith.constant 0 : index
    %c0_48 = arith.constant 0 : index
    %c0_49 = arith.constant 0 : index
    %116 = vector.load %arg13[%c0_47, %c0_48, %c0_49] : memref<3x1x32xf32, #tpu.memory_space<vmem>>, vector<1x1x32xf32>
    %117 = vector.shape_cast %116 : vector<1x1x32xf32> to vector<1x32xf32>
    %c0_50 = arith.constant 0 : index
    %c0_51 = arith.constant 0 : index
    %c0_52 = arith.constant 0 : index
    %118 = vector.load %arg14[%c0_50, %c0_51, %c0_52] : memref<3x1x32xf32, #tpu.memory_space<vmem>>, vector<1x1x32xf32>
    %119 = vector.shape_cast %118 : vector<1x1x32xf32> to vector<1x32xf32>
    %cst_53 = arith.constant dense<0.000000e+00> : vector<16xf32>
    %120 = vector.multi_reduction <add>, %115, %cst_53 [1] : vector<16x32xf32> to vector<16xf32>
    %121 = vector.shape_cast %120 : vector<16xf32> to vector<16x1xf32>
    %cst_54 = arith.constant 3.200000e+01 : f32
    %122 = vector.broadcast %cst_54 : f32 to vector<16x1xf32>
    %123 = arith.divf %121, %122 : vector<16x1xf32>
    %124 = vector.broadcast %123 : vector<16x1xf32> to vector<16x32xf32>
    %125 = arith.subf %115, %124 : vector<16x32xf32>
    %126 = arith.mulf %125, %125 : vector<16x32xf32>
    %cst_55 = arith.constant dense<0.000000e+00> : vector<16xf32>
    %127 = vector.multi_reduction <add>, %126, %cst_55 [1] : vector<16x32xf32> to vector<16xf32>
    %128 = vector.shape_cast %127 : vector<16xf32> to vector<16x1xf32>
    %cst_56 = arith.constant 3.200000e+01 : f32
    %129 = vector.broadcast %cst_56 : f32 to vector<16x1xf32>
    %130 = arith.divf %128, %129 : vector<16x1xf32>
    %131 = vector.broadcast %123 : vector<16x1xf32> to vector<16x32xf32>
    %132 = arith.subf %115, %131 : vector<16x32xf32>
    %cst_57 = arith.constant 9.99999974E-6 : f32
    %133 = vector.broadcast %cst_57 : f32 to vector<16x1xf32>
    %134 = arith.addf %130, %133 : vector<16x1xf32>
    %135 = math.rsqrt %134 : vector<16x1xf32>
    %136 = vector.broadcast %135 : vector<16x1xf32> to vector<16x32xf32>
    %137 = arith.mulf %132, %136 : vector<16x32xf32>
    %138 = vector.broadcast %117 : vector<1x32xf32> to vector<16x32xf32>
    %139 = arith.mulf %137, %138 : vector<16x32xf32>
    %140 = vector.broadcast %119 : vector<1x32xf32> to vector<16x32xf32>
    %141 = arith.addf %139, %140 : vector<16x32xf32>
    %c0_58 = arith.constant 0 : index
    %c0_59 = arith.constant 0 : index
    %c0_60 = arith.constant 0 : index
    %142 = vector.load %arg15[%c0_58, %c0_59, %c0_60] : memref<3x1x32xf32, #tpu.memory_space<vmem>>, vector<1x1x32xf32>
    %143 = vector.shape_cast %142 : vector<1x1x32xf32> to vector<1x32xf32>
    %144 = vector.broadcast %143 : vector<1x32xf32> to vector<16x32xf32>
    %145 = arith.mulf %141, %144 : vector<16x32xf32>
    %cst_61 = arith.constant dense<0.000000e+00> : vector<16xf32>
    %146 = vector.multi_reduction <add>, %145, %cst_61 [1] : vector<16x32xf32> to vector<16xf32>
    %147 = vector.shape_cast %146 : vector<16xf32> to vector<16x1xf32>
    %c0_62 = arith.constant 0 : index
    %148 = memref.load %arg2[%c0_62] : memref<3xf32, #tpu.memory_space<smem>>
    %149 = vector.broadcast %148 : f32 to vector<16x1xf32>
    %150 = arith.addf %147, %149 : vector<16x1xf32>
    %cst_63 = arith.constant 0.000000e+00 : f32
    %151 = vector.broadcast %cst_63 : f32 to vector<16x1xf32>
    %152 = arith.select %5, %151, %150 : vector<16x1xi1>, vector<16x1xf32>
    %c1_i32_64 = arith.constant 1 : i32
    %153 = tpu.dynamic_rotate %99 by %c1_i32_64 dim 0 : vector<16x32xf32>, i32 -> vector<16x32xf32>
    %154 = vector.broadcast %26 : vector<16x1xf32> to vector<16x32xf32>
    %155 = arith.mulf %153, %154 : vector<16x32xf32>
    %c15_i32_65 = arith.constant 15 : i32
    %156 = tpu.dynamic_rotate %99 by %c15_i32_65 dim 0 : vector<16x32xf32>, i32 -> vector<16x32xf32>
    %157 = vector.broadcast %30 : vector<16x1xf32> to vector<16x32xf32>
    %158 = arith.mulf %156, %157 : vector<16x32xf32>
    %159 = tpu.concatenate %155, %99, %158 in 1 : vector<16x32xf32>, vector<16x32xf32>, vector<16x32xf32> -> vector<16x96xf32>
    %c1_66 = arith.constant 1 : index
    %c0_67 = arith.constant 0 : index
    %c0_68 = arith.constant 0 : index
    %160 = vector.load %arg11[%c1_66, %c0_67, %c0_68] : memref<3x96x32xf32, #tpu.memory_space<vmem>>, vector<1x96x32xf32>
    %161 = vector.shape_cast %160 : vector<1x96x32xf32> to vector<96x32xf32>
    %cst_69 = arith.constant dense<0.000000e+00> : vector<16x32xf32>
    %162 = tpu.matmul %159, %161, %cst_69 {dimension_numbers = #tpu.dot_dimension_numbers<[1], [0], [0], [1], [0, 0, 1, 1], [], []>} : vector<16x96xf32>, vector<96x32xf32>, vector<16x32xf32> -> vector<16x32xf32>
    %c1_70 = arith.constant 1 : index
    %c0_71 = arith.constant 0 : index
    %c0_72 = arith.constant 0 : index
    %163 = vector.load %arg12[%c1_70, %c0_71, %c0_72] : memref<3x1x32xf32, #tpu.memory_space<vmem>>, vector<1x1x32xf32>
    %164 = vector.shape_cast %163 : vector<1x1x32xf32> to vector<1x32xf32>
    %165 = vector.broadcast %164 : vector<1x32xf32> to vector<16x32xf32>
    %166 = arith.addf %162, %165 : vector<16x32xf32>
    %cst_73 = arith.constant 0.000000e+00 : f32
    %167 = vector.broadcast %cst_73 : f32 to vector<16x32xf32>
    %168 = arith.maximumf %166, %167 : vector<16x32xf32>
    %c1_74 = arith.constant 1 : index
    %c0_75 = arith.constant 0 : index
    %c0_76 = arith.constant 0 : index
    %169 = vector.load %arg13[%c1_74, %c0_75, %c0_76] : memref<3x1x32xf32, #tpu.memory_space<vmem>>, vector<1x1x32xf32>
    %170 = vector.shape_cast %169 : vector<1x1x32xf32> to vector<1x32xf32>
    %c1_77 = arith.constant 1 : index
    %c0_78 = arith.constant 0 : index
    %c0_79 = arith.constant 0 : index
    %171 = vector.load %arg14[%c1_77, %c0_78, %c0_79] : memref<3x1x32xf32, #tpu.memory_space<vmem>>, vector<1x1x32xf32>
    %172 = vector.shape_cast %171 : vector<1x1x32xf32> to vector<1x32xf32>
    %cst_80 = arith.constant dense<0.000000e+00> : vector<16xf32>
    %173 = vector.multi_reduction <add>, %168, %cst_80 [1] : vector<16x32xf32> to vector<16xf32>
    %174 = vector.shape_cast %173 : vector<16xf32> to vector<16x1xf32>
    %cst_81 = arith.constant 3.200000e+01 : f32
    %175 = vector.broadcast %cst_81 : f32 to vector<16x1xf32>
    %176 = arith.divf %174, %175 : vector<16x1xf32>
    %177 = vector.broadcast %176 : vector<16x1xf32> to vector<16x32xf32>
    %178 = arith.subf %168, %177 : vector<16x32xf32>
    %179 = arith.mulf %178, %178 : vector<16x32xf32>
    %cst_82 = arith.constant dense<0.000000e+00> : vector<16xf32>
    %180 = vector.multi_reduction <add>, %179, %cst_82 [1] : vector<16x32xf32> to vector<16xf32>
    %181 = vector.shape_cast %180 : vector<16xf32> to vector<16x1xf32>
    %cst_83 = arith.constant 3.200000e+01 : f32
    %182 = vector.broadcast %cst_83 : f32 to vector<16x1xf32>
    %183 = arith.divf %181, %182 : vector<16x1xf32>
    %184 = vector.broadcast %176 : vector<16x1xf32> to vector<16x32xf32>
    %185 = arith.subf %168, %184 : vector<16x32xf32>
    %cst_84 = arith.constant 9.99999974E-6 : f32
    %186 = vector.broadcast %cst_84 : f32 to vector<16x1xf32>
    %187 = arith.addf %183, %186 : vector<16x1xf32>
    %188 = math.rsqrt %187 : vector<16x1xf32>
    %189 = vector.broadcast %188 : vector<16x1xf32> to vector<16x32xf32>
    %190 = arith.mulf %185, %189 : vector<16x32xf32>
    %191 = vector.broadcast %170 : vector<1x32xf32> to vector<16x32xf32>
    %192 = arith.mulf %190, %191 : vector<16x32xf32>
    %193 = vector.broadcast %172 : vector<1x32xf32> to vector<16x32xf32>
    %194 = arith.addf %192, %193 : vector<16x32xf32>
    %c1_85 = arith.constant 1 : index
    %c0_86 = arith.constant 0 : index
    %c0_87 = arith.constant 0 : index
    %195 = vector.load %arg15[%c1_85, %c0_86, %c0_87] : memref<3x1x32xf32, #tpu.memory_space<vmem>>, vector<1x1x32xf32>
    %196 = vector.shape_cast %195 : vector<1x1x32xf32> to vector<1x32xf32>
    %197 = vector.broadcast %196 : vector<1x32xf32> to vector<16x32xf32>
    %198 = arith.mulf %194, %197 : vector<16x32xf32>
    %cst_88 = arith.constant dense<0.000000e+00> : vector<16xf32>
    %199 = vector.multi_reduction <add>, %198, %cst_88 [1] : vector<16x32xf32> to vector<16xf32>
    %200 = vector.shape_cast %199 : vector<16xf32> to vector<16x1xf32>
    %c1_89 = arith.constant 1 : index
    %201 = memref.load %arg2[%c1_89] : memref<3xf32, #tpu.memory_space<smem>>
    %202 = vector.broadcast %201 : f32 to vector<16x1xf32>
    %203 = arith.addf %200, %202 : vector<16x1xf32>
    %cst_90 = arith.constant 0.000000e+00 : f32
    %204 = vector.broadcast %cst_90 : f32 to vector<16x1xf32>
    %205 = arith.select %5, %204, %203 : vector<16x1xi1>, vector<16x1xf32>
    %c0_91 = arith.constant 0 : index
    %206 = memref.load %arg1[%c0_91] : memref<2xf32, #tpu.memory_space<smem>>
    %207 = vector.broadcast %206 : f32 to vector<16x1xf32>
    %208 = arith.mulf %205, %207 : vector<16x1xf32>
    %c0_92 = arith.constant 0 : index
    %c0_93 = arith.constant 0 : index
    %c0_94 = arith.constant 0 : index
    %209 = vector.load %arg16[%c0_92, %c0_93, %c0_94] : memref<2x1x15xf32, #tpu.memory_space<vmem>>, vector<1x1x15xf32>
    %210 = vector.shape_cast %209 : vector<1x1x15xf32> to vector<1x15xf32>
    %211 = vector.broadcast %208 : vector<16x1xf32> to vector<16x15xf32>
    %212 = vector.broadcast %210 : vector<1x15xf32> to vector<16x15xf32>
    %213 = arith.cmpf ogt, %211, %212 : vector<16x15xf32>
    %214 = arith.extui %213 : vector<16x15xi1> to vector<16x15xi32>
    %cst_95 = arith.constant dense<0> : vector<16xi32>
    %215 = vector.multi_reduction <add>, %214, %cst_95 [1] : vector<16x15xi32> to vector<16xi32>
    %216 = vector.shape_cast %215 : vector<16xi32> to vector<16x1xi32>
    %217 = vector.broadcast %216 : vector<16x1xi32> to vector<16x16xi32>
    %218 = arith.cmpi eq, %217, %31 : vector<16x16xi32>
    %219 = arith.extui %218 : vector<16x16xi1> to vector<16x16xi32>
    %220 = arith.sitofp %219 : vector<16x16xi32> to vector<16x16xf32>
    %c0_96 = arith.constant 0 : index
    %c0_97 = arith.constant 0 : index
    %c0_98 = arith.constant 0 : index
    %221 = vector.load %arg17[%c0_96, %c0_97, %c0_98] : memref<2x16x32xf32, #tpu.memory_space<vmem>>, vector<1x16x32xf32>
    %222 = vector.shape_cast %221 : vector<1x16x32xf32> to vector<16x32xf32>
    %cst_99 = arith.constant dense<0.000000e+00> : vector<16x32xf32>
    %223 = tpu.matmul %220, %222, %cst_99 {dimension_numbers = #tpu.dot_dimension_numbers<[1], [0], [0], [1], [0, 0, 1, 1], [], []>} : vector<16x16xf32>, vector<16x32xf32>, vector<16x32xf32> -> vector<16x32xf32>
    %224 = arith.addf %1, %223 : vector<16x32xf32>
    %c1_i32_100 = arith.constant 1 : i32
    %225 = tpu.dynamic_rotate %224 by %c1_i32_100 dim 0 : vector<16x32xf32>, i32 -> vector<16x32xf32>
    %226 = vector.broadcast %26 : vector<16x1xf32> to vector<16x32xf32>
    %227 = arith.mulf %225, %226 : vector<16x32xf32>
    %c15_i32_101 = arith.constant 15 : i32
    %228 = tpu.dynamic_rotate %224 by %c15_i32_101 dim 0 : vector<16x32xf32>, i32 -> vector<16x32xf32>
    %229 = vector.broadcast %30 : vector<16x1xf32> to vector<16x32xf32>
    %230 = arith.mulf %228, %229 : vector<16x32xf32>
    %231 = tpu.concatenate %227, %224, %230 in 1 : vector<16x32xf32>, vector<16x32xf32>, vector<16x32xf32> -> vector<16x96xf32>
    %c0_102 = arith.constant 0 : index
    %c0_103 = arith.constant 0 : index
    %232 = vector.load %arg7[%c0_102, %c0_103] : memref<96x32xf32, #tpu.memory_space<vmem>>, vector<96x32xf32>
    %cst_104 = arith.constant dense<0.000000e+00> : vector<16x32xf32>
    %233 = tpu.matmul %231, %232, %cst_104 {dimension_numbers = #tpu.dot_dimension_numbers<[1], [0], [0], [1], [0, 0, 1, 1], [], []>} : vector<16x96xf32>, vector<96x32xf32>, vector<16x32xf32> -> vector<16x32xf32>
    %c0_105 = arith.constant 0 : index
    %c0_106 = arith.constant 0 : index
    %234 = vector.load %arg8[%c0_105, %c0_106] : memref<1x32xf32, #tpu.memory_space<vmem>>, vector<1x32xf32>
    %235 = vector.broadcast %234 : vector<1x32xf32> to vector<16x32xf32>
    %236 = arith.addf %233, %235 : vector<16x32xf32>
    %cst_107 = arith.constant 0.000000e+00 : f32
    %237 = vector.broadcast %cst_107 : f32 to vector<16x32xf32>
    %238 = arith.maximumf %236, %237 : vector<16x32xf32>
    %c2 = arith.constant 2 : index
    %c0_108 = arith.constant 0 : index
    %c0_109 = arith.constant 0 : index
    %239 = vector.load %arg9[%c2, %c0_108, %c0_109] : memref<3x1x32xf32, #tpu.memory_space<vmem>>, vector<1x1x32xf32>
    %240 = vector.shape_cast %239 : vector<1x1x32xf32> to vector<1x32xf32>
    %c2_110 = arith.constant 2 : index
    %c0_111 = arith.constant 0 : index
    %c0_112 = arith.constant 0 : index
    %241 = vector.load %arg10[%c2_110, %c0_111, %c0_112] : memref<3x1x32xf32, #tpu.memory_space<vmem>>, vector<1x1x32xf32>
    %242 = vector.shape_cast %241 : vector<1x1x32xf32> to vector<1x32xf32>
    %cst_113 = arith.constant dense<0.000000e+00> : vector<16xf32>
    %243 = vector.multi_reduction <add>, %238, %cst_113 [1] : vector<16x32xf32> to vector<16xf32>
    %244 = vector.shape_cast %243 : vector<16xf32> to vector<16x1xf32>
    %cst_114 = arith.constant 3.200000e+01 : f32
    %245 = vector.broadcast %cst_114 : f32 to vector<16x1xf32>
    %246 = arith.divf %244, %245 : vector<16x1xf32>
    %247 = vector.broadcast %246 : vector<16x1xf32> to vector<16x32xf32>
    %248 = arith.subf %238, %247 : vector<16x32xf32>
    %249 = arith.mulf %248, %248 : vector<16x32xf32>
    %cst_115 = arith.constant dense<0.000000e+00> : vector<16xf32>
    %250 = vector.multi_reduction <add>, %249, %cst_115 [1] : vector<16x32xf32> to vector<16xf32>
    %251 = vector.shape_cast %250 : vector<16xf32> to vector<16x1xf32>
    %cst_116 = arith.constant 3.200000e+01 : f32
    %252 = vector.broadcast %cst_116 : f32 to vector<16x1xf32>
    %253 = arith.divf %251, %252 : vector<16x1xf32>
    %254 = vector.broadcast %246 : vector<16x1xf32> to vector<16x32xf32>
    %255 = arith.subf %238, %254 : vector<16x32xf32>
    %cst_117 = arith.constant 9.99999974E-6 : f32
    %256 = vector.broadcast %cst_117 : f32 to vector<16x1xf32>
    %257 = arith.addf %253, %256 : vector<16x1xf32>
    %258 = math.rsqrt %257 : vector<16x1xf32>
    %259 = vector.broadcast %258 : vector<16x1xf32> to vector<16x32xf32>
    %260 = arith.mulf %255, %259 : vector<16x32xf32>
    %261 = vector.broadcast %240 : vector<1x32xf32> to vector<16x32xf32>
    %262 = arith.mulf %260, %261 : vector<16x32xf32>
    %263 = vector.broadcast %242 : vector<1x32xf32> to vector<16x32xf32>
    %264 = arith.addf %262, %263 : vector<16x32xf32>
    %c1_i32_118 = arith.constant 1 : i32
    %265 = tpu.dynamic_rotate %264 by %c1_i32_118 dim 0 : vector<16x32xf32>, i32 -> vector<16x32xf32>
    %266 = vector.broadcast %26 : vector<16x1xf32> to vector<16x32xf32>
    %267 = arith.mulf %265, %266 : vector<16x32xf32>
    %c15_i32_119 = arith.constant 15 : i32
    %268 = tpu.dynamic_rotate %264 by %c15_i32_119 dim 0 : vector<16x32xf32>, i32 -> vector<16x32xf32>
    %269 = vector.broadcast %30 : vector<16x1xf32> to vector<16x32xf32>
    %270 = arith.mulf %268, %269 : vector<16x32xf32>
    %271 = tpu.concatenate %267, %264, %270 in 1 : vector<16x32xf32>, vector<16x32xf32>, vector<16x32xf32> -> vector<16x96xf32>
    %c2_120 = arith.constant 2 : index
    %c0_121 = arith.constant 0 : index
    %c0_122 = arith.constant 0 : index
    %272 = vector.load %arg11[%c2_120, %c0_121, %c0_122] : memref<3x96x32xf32, #tpu.memory_space<vmem>>, vector<1x96x32xf32>
    %273 = vector.shape_cast %272 : vector<1x96x32xf32> to vector<96x32xf32>
    %cst_123 = arith.constant dense<0.000000e+00> : vector<16x32xf32>
    %274 = tpu.matmul %271, %273, %cst_123 {dimension_numbers = #tpu.dot_dimension_numbers<[1], [0], [0], [1], [0, 0, 1, 1], [], []>} : vector<16x96xf32>, vector<96x32xf32>, vector<16x32xf32> -> vector<16x32xf32>
    %c2_124 = arith.constant 2 : index
    %c0_125 = arith.constant 0 : index
    %c0_126 = arith.constant 0 : index
    %275 = vector.load %arg12[%c2_124, %c0_125, %c0_126] : memref<3x1x32xf32, #tpu.memory_space<vmem>>, vector<1x1x32xf32>
    %276 = vector.shape_cast %275 : vector<1x1x32xf32> to vector<1x32xf32>
    %277 = vector.broadcast %276 : vector<1x32xf32> to vector<16x32xf32>
    %278 = arith.addf %274, %277 : vector<16x32xf32>
    %cst_127 = arith.constant 0.000000e+00 : f32
    %279 = vector.broadcast %cst_127 : f32 to vector<16x32xf32>
    %280 = arith.maximumf %278, %279 : vector<16x32xf32>
    %c2_128 = arith.constant 2 : index
    %c0_129 = arith.constant 0 : index
    %c0_130 = arith.constant 0 : index
    %281 = vector.load %arg13[%c2_128, %c0_129, %c0_130] : memref<3x1x32xf32, #tpu.memory_space<vmem>>, vector<1x1x32xf32>
    %282 = vector.shape_cast %281 : vector<1x1x32xf32> to vector<1x32xf32>
    %c2_131 = arith.constant 2 : index
    %c0_132 = arith.constant 0 : index
    %c0_133 = arith.constant 0 : index
    %283 = vector.load %arg14[%c2_131, %c0_132, %c0_133] : memref<3x1x32xf32, #tpu.memory_space<vmem>>, vector<1x1x32xf32>
    %284 = vector.shape_cast %283 : vector<1x1x32xf32> to vector<1x32xf32>
    %cst_134 = arith.constant dense<0.000000e+00> : vector<16xf32>
    %285 = vector.multi_reduction <add>, %280, %cst_134 [1] : vector<16x32xf32> to vector<16xf32>
    %286 = vector.shape_cast %285 : vector<16xf32> to vector<16x1xf32>
    %cst_135 = arith.constant 3.200000e+01 : f32
    %287 = vector.broadcast %cst_135 : f32 to vector<16x1xf32>
    %288 = arith.divf %286, %287 : vector<16x1xf32>
    %289 = vector.broadcast %288 : vector<16x1xf32> to vector<16x32xf32>
    %290 = arith.subf %280, %289 : vector<16x32xf32>
    %291 = arith.mulf %290, %290 : vector<16x32xf32>
    %cst_136 = arith.constant dense<0.000000e+00> : vector<16xf32>
    %292 = vector.multi_reduction <add>, %291, %cst_136 [1] : vector<16x32xf32> to vector<16xf32>
    %293 = vector.shape_cast %292 : vector<16xf32> to vector<16x1xf32>
    %cst_137 = arith.constant 3.200000e+01 : f32
    %294 = vector.broadcast %cst_137 : f32 to vector<16x1xf32>
    %295 = arith.divf %293, %294 : vector<16x1xf32>
    %296 = vector.broadcast %288 : vector<16x1xf32> to vector<16x32xf32>
    %297 = arith.subf %280, %296 : vector<16x32xf32>
    %cst_138 = arith.constant 9.99999974E-6 : f32
    %298 = vector.broadcast %cst_138 : f32 to vector<16x1xf32>
    %299 = arith.addf %295, %298 : vector<16x1xf32>
    %300 = math.rsqrt %299 : vector<16x1xf32>
    %301 = vector.broadcast %300 : vector<16x1xf32> to vector<16x32xf32>
    %302 = arith.mulf %297, %301 : vector<16x32xf32>
    %303 = vector.broadcast %282 : vector<1x32xf32> to vector<16x32xf32>
    %304 = arith.mulf %302, %303 : vector<16x32xf32>
    %305 = vector.broadcast %284 : vector<1x32xf32> to vector<16x32xf32>
    %306 = arith.addf %304, %305 : vector<16x32xf32>
    %c2_139 = arith.constant 2 : index
    %c0_140 = arith.constant 0 : index
    %c0_141 = arith.constant 0 : index
    %307 = vector.load %arg15[%c2_139, %c0_140, %c0_141] : memref<3x1x32xf32, #tpu.memory_space<vmem>>, vector<1x1x32xf32>
    %308 = vector.shape_cast %307 : vector<1x1x32xf32> to vector<1x32xf32>
    %309 = vector.broadcast %308 : vector<1x32xf32> to vector<16x32xf32>
    %310 = arith.mulf %306, %309 : vector<16x32xf32>
    %cst_142 = arith.constant dense<0.000000e+00> : vector<16xf32>
    %311 = vector.multi_reduction <add>, %310, %cst_142 [1] : vector<16x32xf32> to vector<16xf32>
    %312 = vector.shape_cast %311 : vector<16xf32> to vector<16x1xf32>
    %c2_143 = arith.constant 2 : index
    %313 = memref.load %arg2[%c2_143] : memref<3xf32, #tpu.memory_space<smem>>
    %314 = vector.broadcast %313 : f32 to vector<16x1xf32>
    %315 = arith.addf %312, %314 : vector<16x1xf32>
    %cst_144 = arith.constant 0.000000e+00 : f32
    %316 = vector.broadcast %cst_144 : f32 to vector<16x1xf32>
    %317 = arith.select %5, %316, %315 : vector<16x1xi1>, vector<16x1xf32>
    %c1_145 = arith.constant 1 : index
    %318 = memref.load %arg1[%c1_145] : memref<2xf32, #tpu.memory_space<smem>>
    %319 = vector.broadcast %318 : f32 to vector<16x1xf32>
    %320 = arith.mulf %317, %319 : vector<16x1xf32>
    %c1_146 = arith.constant 1 : index
    %c0_147 = arith.constant 0 : index
    %c0_148 = arith.constant 0 : index
    %321 = vector.load %arg16[%c1_146, %c0_147, %c0_148] : memref<2x1x15xf32, #tpu.memory_space<vmem>>, vector<1x1x15xf32>
    %322 = vector.shape_cast %321 : vector<1x1x15xf32> to vector<1x15xf32>
    %323 = vector.broadcast %320 : vector<16x1xf32> to vector<16x15xf32>
    %324 = vector.broadcast %322 : vector<1x15xf32> to vector<16x15xf32>
    %325 = arith.cmpf ogt, %323, %324 : vector<16x15xf32>
    %326 = arith.extui %325 : vector<16x15xi1> to vector<16x15xi32>
    %cst_149 = arith.constant dense<0> : vector<16xi32>
    %327 = vector.multi_reduction <add>, %326, %cst_149 [1] : vector<16x15xi32> to vector<16xi32>
    %328 = vector.shape_cast %327 : vector<16xi32> to vector<16x1xi32>
    %329 = vector.broadcast %328 : vector<16x1xi32> to vector<16x16xi32>
    %330 = arith.cmpi eq, %329, %31 : vector<16x16xi32>
    %331 = arith.extui %330 : vector<16x16xi1> to vector<16x16xi32>
    %332 = arith.sitofp %331 : vector<16x16xi32> to vector<16x16xf32>
    %c1_150 = arith.constant 1 : index
    %c0_151 = arith.constant 0 : index
    %c0_152 = arith.constant 0 : index
    %333 = vector.load %arg17[%c1_150, %c0_151, %c0_152] : memref<2x16x32xf32, #tpu.memory_space<vmem>>, vector<1x16x32xf32>
    %334 = vector.shape_cast %333 : vector<1x16x32xf32> to vector<16x32xf32>
    %cst_153 = arith.constant dense<0.000000e+00> : vector<16x32xf32>
    %335 = tpu.matmul %332, %334, %cst_153 {dimension_numbers = #tpu.dot_dimension_numbers<[1], [0], [0], [1], [0, 0, 1, 1], [], []>} : vector<16x16xf32>, vector<16x32xf32>, vector<16x32xf32> -> vector<16x32xf32>
    %336 = arith.addf %224, %335 : vector<16x32xf32>
    %337 = tpu.concatenate %152, %208, %320 in 1 : vector<16x1xf32>, vector<16x1xf32>, vector<16x1xf32> -> vector<16x3xf32>
    %338 = vector.shape_cast %337 : vector<16x3xf32> to vector<2x8x3xf32>
    %c0_154 = arith.constant 0 : index
    %c0_155 = arith.constant 0 : index
    %c0_156 = arith.constant 0 : index
    %339 = vector.load %arg18[%c0_154, %c0_155, %c0_156] : memref<2x8x3xf32, #tpu.memory_space<vmem>>, vector<2x8x3xf32>
    tpu.vector_store %arg18[%c0_154, %c0_155, %c0_156], %338 {strides = array<i32>} : memref<2x8x3xf32, #tpu.memory_space<vmem>>, vector<2x8x3xf32>,
    %340 = vector.shape_cast %336 : vector<16x32xf32> to vector<2x8x32xf32>
    %c0_157 = arith.constant 0 : index
    %c0_158 = arith.constant 0 : index
    %c0_159 = arith.constant 0 : index
    %341 = vector.load %arg19[%c0_157, %c0_158, %c0_159] : memref<2x8x32xf32, #tpu.memory_space<vmem>>, vector<2x8x32xf32>
    tpu.vector_store %arg19[%c0_157, %c0_158, %c0_159], %340 {strides = array<i32>} : memref<2x8x32xf32, #tpu.memory_space<vmem>>, vector<2x8x32xf32>,
    return
  }
  func.func @transform_0(%arg0: i32) -> i32 {
    %c0_i32 = arith.constant 0 : i32
    %c0_i32_0 = arith.constant 0 : i32
    return %c0_i32 : i32
  }
  func.func @transform_1(%arg0: i32) -> i32 {
    %c0_i32 = arith.constant 0 : i32
    %c0_i32_0 = arith.constant 0 : i32
    return %c0_i32 : i32
  }
  func.func @transform_2(%arg0: i32) -> (i32, i32, i32) {
    %c0_i32 = arith.constant 0 : i32
    %c0_i32_0 = arith.constant 0 : i32
    %c0_i32_1 = arith.constant 0 : i32
    return %arg0, %c0_i32, %c0_i32_0 : i32, i32, i32
  }
  func.func @transform_3(%arg0: i32) -> (i32, i32, i32) {
    %c0_i32 = arith.constant 0 : i32
    %c0_i32_0 = arith.constant 0 : i32
    %c0_i32_1 = arith.constant 0 : i32
    return %arg0, %c0_i32, %c0_i32_0 : i32, i32, i32
  }
  func.func @transform_4(%arg0: i32) -> (i32, i32) {
    %c0_i32 = arith.constant 0 : i32
    %c0_i32_0 = arith.constant 0 : i32
    %c0_i32_1 = arith.constant 0 : i32
    return %c0_i32, %c0_i32_0 : i32, i32
  }
  func.func @transform_5(%arg0: i32) -> (i32, i32) {
    %c0_i32 = arith.constant 0 : i32
    %c0_i32_0 = arith.constant 0 : i32
    %c0_i32_1 = arith.constant 0 : i32
    return %c0_i32, %c0_i32_0 : i32, i32
  }
  func.func @transform_6(%arg0: i32) -> (i32, i32) {
    %c0_i32 = arith.constant 0 : i32
    %c0_i32_0 = arith.constant 0 : i32
    %c0_i32_1 = arith.constant 0 : i32
    return %c0_i32, %c0_i32_0 : i32, i32
  }
  func.func @transform_7(%arg0: i32) -> (i32, i32) {
    %c0_i32 = arith.constant 0 : i32
    %c0_i32_0 = arith.constant 0 : i32
    %c0_i32_1 = arith.constant 0 : i32
    return %c0_i32, %c0_i32_0 : i32, i32
  }
  func.func @transform_8(%arg0: i32) -> (i32, i32, i32) {
    %c0_i32 = arith.constant 0 : i32
    %c0_i32_0 = arith.constant 0 : i32
    %c0_i32_1 = arith.constant 0 : i32
    %c0_i32_2 = arith.constant 0 : i32
    return %c0_i32, %c0_i32_0, %c0_i32_1 : i32, i32, i32
  }
  func.func @transform_9(%arg0: i32) -> (i32, i32, i32) {
    %c0_i32 = arith.constant 0 : i32
    %c0_i32_0 = arith.constant 0 : i32
    %c0_i32_1 = arith.constant 0 : i32
    %c0_i32_2 = arith.constant 0 : i32
    return %c0_i32, %c0_i32_0, %c0_i32_1 : i32, i32, i32
  }
  func.func @transform_10(%arg0: i32) -> (i32, i32, i32) {
    %c0_i32 = arith.constant 0 : i32
    %c0_i32_0 = arith.constant 0 : i32
    %c0_i32_1 = arith.constant 0 : i32
    %c0_i32_2 = arith.constant 0 : i32
    return %c0_i32, %c0_i32_0, %c0_i32_1 : i32, i32, i32
  }
  func.func @transform_11(%arg0: i32) -> (i32, i32, i32) {
    %c0_i32 = arith.constant 0 : i32
    %c0_i32_0 = arith.constant 0 : i32
    %c0_i32_1 = arith.constant 0 : i32
    %c0_i32_2 = arith.constant 0 : i32
    return %c0_i32, %c0_i32_0, %c0_i32_1 : i32, i32, i32
  }
  func.func @transform_12(%arg0: i32) -> (i32, i32, i32) {
    %c0_i32 = arith.constant 0 : i32
    %c0_i32_0 = arith.constant 0 : i32
    %c0_i32_1 = arith.constant 0 : i32
    %c0_i32_2 = arith.constant 0 : i32
    return %c0_i32, %c0_i32_0, %c0_i32_1 : i32, i32, i32
  }
  func.func @transform_13(%arg0: i32) -> (i32, i32, i32) {
    %c0_i32 = arith.constant 0 : i32
    %c0_i32_0 = arith.constant 0 : i32
    %c0_i32_1 = arith.constant 0 : i32
    %c0_i32_2 = arith.constant 0 : i32
    return %c0_i32, %c0_i32_0, %c0_i32_1 : i32, i32, i32
  }
  func.func @transform_14(%arg0: i32) -> (i32, i32, i32) {
    %c0_i32 = arith.constant 0 : i32
    %c0_i32_0 = arith.constant 0 : i32
    %c0_i32_1 = arith.constant 0 : i32
    %c0_i32_2 = arith.constant 0 : i32
    return %c0_i32, %c0_i32_0, %c0_i32_1 : i32, i32, i32
  }
  func.func @transform_15(%arg0: i32) -> (i32, i32, i32) {
    %c0_i32 = arith.constant 0 : i32
    %c0_i32_0 = arith.constant 0 : i32
    %c0_i32_1 = arith.constant 0 : i32
    %c0_i32_2 = arith.constant 0 : i32
    return %c0_i32, %c0_i32_0, %c0_i32_1 : i32, i32, i32
  }
  func.func @transform_16(%arg0: i32) -> (i32, i32, i32) {
    %c0_i32 = arith.constant 0 : i32
    %c0_i32_0 = arith.constant 0 : i32
    %c0_i32_1 = arith.constant 0 : i32
    %c0_i32_2 = arith.constant 0 : i32
    return %c0_i32, %c0_i32_0, %c0_i32_1 : i32, i32, i32
  }
  func.func @transform_17(%arg0: i32) -> (i32, i32, i32) {
    %c0_i32 = arith.constant 0 : i32
    %c0_i32_0 = arith.constant 0 : i32
    %c0_i32_1 = arith.constant 0 : i32
    return %arg0, %c0_i32, %c0_i32_0 : i32, i32, i32
  }
  func.func @transform_18(%arg0: i32) -> (i32, i32, i32) {
    %c0_i32 = arith.constant 0 : i32
    %c0_i32_0 = arith.constant 0 : i32
    %c0_i32_1 = arith.constant 0 : i32
    return %arg0, %c0_i32, %c0_i32_0 : i32, i32, i32
  }
}

</mosaic_0001>

<bundles_post_ra>
// kernel: tpu_custom_call.1
= control target key start
LH: loop header
LB: loop body
LE: loop exit
PB: predicated region body
PF: predicated region fallthrough
CT: control target
= control target key end

     0   :  { %s3627_s0 = inlined_call_operand.vmem [shape: f32[2], index: 0, kind: input, shape index: {}]   ;;  %s3628_s1 = inlined_call_operand.vmem [shape: f32[3], index: 1, kind: input, shape index: {}]   ;;  %s3629_s2 = inlined_call_operand.vmem [shape: f32[4,8,32], index: 2, kind: input, shape index: {}]   ;;  %s3630_s3 = inlined_call_operand.vmem [shape: f32[4,8,1], index: 3, kind: input, shape index: {}]   ;;  %s3631_s4 = inlined_call_operand.vmem [shape: f32[96,64], index: 4, kind: input, shape index: {}]   ;;  %s3632_s5 = inlined_call_operand.vmem [shape: f32[1,64], index: 5, kind: input, shape index: {}]   ;;  %s3633_s6 = inlined_call_operand.vmem [shape: f32[96,32], index: 6, kind: input, shape index: {}]   ;;  %s3634_s7 = inlined_call_operand.vmem [shape: f32[1,32], index: 7, kind: input, shape index: {}]   ;;  %s3635_s8 = inlined_call_operand.vmem [shape: f32[3,1,32], index: 8, kind: input, shape index: {}]   ;;  %s3636_s9 = inlined_call_operand.vmem [shape: f32[3,1,32], index: 9, kind: input, shape index: {}]   ;;  %s3637_s10 = inlined_call_operand.vmem [shape: f32[3,96,32], index: 10, kind: input, shape index: {}]   ;;  %s3638_s11 = inlined_call_operand.vmem [shape: f32[3,1,32], index: 11, kind: input, shape index: {}]   ;;  %s3639_s12 = inlined_call_operand.vmem [shape: f32[3,1,32], index: 12, kind: input, shape index: {}]   ;;  %s3640_s13 = inlined_call_operand.vmem [shape: f32[3,1,32], index: 13, kind: input, shape index: {}]   ;;  %s3641_s14 = inlined_call_operand.vmem [shape: f32[3,1,32], index: 14, kind: input, shape index: {}]   ;;  %s3642_s15 = inlined_call_operand.vmem [shape: f32[2,1,15], index: 15, kind: input, shape index: {}]   ;;  %s3643_s16 = inlined_call_operand.vmem [shape: f32[2,16,32], index: 16, kind: input, shape index: {}]   ;;  %s3644_s17 = inlined_call_operand.vmem [shape: f32[4,8,3], index: 17, kind: output, shape index: {0}]   ;;  %s3645_s18 = inlined_call_operand.hbm [shape: f32[4,8,32], index: 18, kind: output, shape index: {1}]  }
   0x1   :  { %3658 = sst [smem:[#allocation16_spill]] %s3627_s0 }
   0x2   :  { %3659 = sst [smem:[#allocation17_spill]] %s3628_s1 }
   0x3   :  { %3660 = sst [smem:[#allocation18_spill]] %s3629_s2 }
   0x4   :  { %3661 = sst [smem:[#allocation19_spill]] %s3630_s3 }
   0x5   :  { %3662 = sst [smem:[#allocation20_spill]] %s3631_s4 }
   0x6   :  { %24 = vsyncpa [#allocation4], 0 }
   0x7   :  { %25 = vsyncpa [#allocation6], 0 }
   0x8   :  { %26 = vsyncpa [#allocation3], 0 }
   0x9   :  { %28 = vsyncpa [#allocation3 + $0x1], 0  ;;  %s2945_s27 = smov 0   ;;  %s2947_s28 = smov 0  }
   0xa   :  { %s2949_s29 = smov 0   ;;  %s2951_s30 = smov 0  }
   0xb LB: > { %3663 = sst [smem:[#allocation11_spill]] %s2824_s27  ;;  %s2966_s0 = sadd.s32 4294967295, %s2836_s30   ;;  %s2836_s30 = sphi %s2951_s30, %s3688_s30   ;;  %s2832_s29 = sphi %s2949_s29, %s3690_s29   ;;  %s2828_s28 = sphi %s2947_s28, %s3692_s28   ;;  %s2824_s27 = sphi %s2945_s27, %s3691_s27  }
   0xc   : > { %3664 = sst [smem:[#allocation12_spill]] %s2832_s29  ;;  %s2179_s19 = sadd.s32 4294967294, %s2836_s30  }
   0xd   : > { %s2970_s1 = sadd.s32 1, %s2836_s30   ;;  %s434_s20 = sadd.s32 1, %s2832_s29 }
   0xe   : > { %3665 = sst [smem:[#allocation13_spill]] %s2970_s1  ;;  %s431_s21 = ssub.s32 %s2836_s30, %s2970_s1 }
   0xf   : > { %p444_p0 = scmp.ne.s32.totalorder %s2832_s29, %s2828_s28  ;;  %p432_p1 = scmp.eq.s32.totalorder %s431_s21, 0 }
  0x10   : > { %p445_p2 = scmp.eq.s32.totalorder %s2966_s0, 1  ;;  %p450_p3 = scmp.ne.s32.totalorder %s2828_s28, %s2824_s27 }
  0x11   : > { %p451_p4 = scmp.eq.s32.totalorder %s2179_s19, 1  ;;  %p2180_p7 = scmp.ge.s32.totalorder %s2836_s30, 1 }
  0x12   : > { %s2981_s22 = scalar_select %p432_p1, %s2832_s29, %s434_s20  }
  0x13   : > { %p2983_p5 = por %p445_p2, %p444_p0  ;;  %p2987_p6 = por %p451_p4, %p450_p3 }
  0x14   : > { %3666 = sst [smem:[#allocation14_spill]] %s2981_s22  ;;  %p458_p8 = scmp.lt.s32.totalorder %s2836_s30, 3 }
  0x15   : > { %s3667_s2 = scalar_select %p2983_p5, 1, 0 }
  0x16   : > { %s3668_s23 = scalar_select %p2987_p6, 1, 0 }
  0x17   : > { %p3651_p9 = scmp.eq.s32.totalorder %s2966_s0, 0  ;;  %p2994_p10 = pnand %p2180_p7, %p458_p8 }
  0x18   : > { %3669 = sst [smem:[#allocation15_spill]] %s3668_s23  ;;  %s3671_s19 = sld [smem:[#allocation16_spill]] }
  0x19   : > { %s3670_s24 = scalar_select %p2994_p10, 1, 0 }
  0x1a   : > { %p2651_p11 = pneg %p2994_p10  ;;  %s3672_s29 = sld [smem:[#allocation17_spill]] }
  0x1c   : > { %p3008_p12 = pnand %p3651_p9, %p2651_p11 }
  0x1e   : > { %s471_s20 = sshll.u32 %s3671_s19, 4  ;;  %p2738_p0 = pneg %p3008_p12  ;;  %s472_s20 = int_to_ptr.vmem [resolvable:$true] %s471_s20 }
  0x1f   : > { %s2736_s27 = scalar_lea.vmem %s472_s20, 16  ;;  %p2744_p3 = scmp.lt.s32.totalorder %s472_s20, %s472_s20 }
  0x20   : > { %s482_s1 = sshll.u32 %s3672_s29, 4  ;;  %p2737_p13 = scmp.ne.s32.totalorder %s472_s20, %s2736_s27  ;;  %s483_s1 = int_to_ptr.vmem [resolvable:$true] %s482_s1 }
  0x21   : > { %p2745_p4 = scmp.lt.s32.totalorder %s2736_s27, %s2736_s27 }
  0x22   : > { %p2739_p1 = pnand %p2738_p0, %p2737_p13 }
  0x23   : > { %p2746_p7 = por %p2745_p4, %p2744_p3 }
  0x24   : > { %p2740_p2 = pneg %p2739_p1 }
  0x26   : > { %p2747_p8 = pnand %p2746_p7, %p2740_p2 }
  0x28   : > { %2750 = shalt.err (!%p2747_p8)
}
  0x29   : > { %s2838_s29 = smov [#allocation2]   ;;  %s2751_s22 = scalar_lea.vmem %s483_s1, 16 }
  0x2a   : > { %2654 = dma.vmem_to_smem (!%p3008_p12), %s472_s20, 16, %s2838_s29, [#allocation4]  }
  0x2b   : > { %p2752_p11 = scmp.ne.s32.totalorder %s483_s1, %s2751_s22  ;;  %p2759_p5 = scmp.lt.s32.totalorder %s483_s1, %s483_s1 }
  0x2c   : > { %p2760_p10 = scmp.lt.s32.totalorder %s2751_s22, %s2751_s22 }
  0x2d   : > { %p2754_p9 = pnand %p2752_p11, %p2738_p0 }
  0x2e   : > { %p2761_p13 = por %p2760_p10, %p2759_p5 }
  0x2f   : > { %p2755_p6 = pneg %p2754_p9 }
  0x31   : > { %p2762_p1 = pnand %p2761_p13, %p2755_p6 }
  0x33   : > { %2765 = shalt.err (!%p2762_p1)
}
  0x34   : > { %s2839_s25 = smov [#allocation5]   ;;  %p3674_p2 = scmp.ne.s32.totalorder %s3670_s24, 0 }
  0x35   : > { %2657 = dma.vmem_to_smem (!%p3008_p12), %s483_s1, 16, %s2839_s25, [#allocation6]  }
  0x36   : > { %552 = sbr.rel (%p3674_p2) target bundleno = 4473 (0x1179), region = 88  ;;  %p3675_p3 = scmp.eq.s32.totalorder (!%p3674_p2), %s2966_s0, 0 }
  0x3d   : > { %2811 = dma.done.wait (%p3675_p3), [#allocation4], 16   ;;  %p3676_p4 = pmov %p3675_p3 }
  0x3e   : > { %p3677_p9 = pmov %p3675_p3 }
  0x3f   : > { %2813 = vsyncadd (%p3676_p4), [#allocation4], 4294967280 }
  0x40   : > { %2815 = dma.done.wait (%p3677_p9), [#allocation6], 16   ;;  %p3678_p5 = pmov %p3675_p3 }
  0x42   : > { %2817 = vsyncadd (%p3678_p5), [#allocation6], 4294967280 }
  0x43   : > { %562 = sfence }
  0x44   : > { %s2188_s27 = sshll.u32 %s2966_s0, 1  ;;  %v646_v0 = vlaneseq  ;;  %s3679_s4 = sld [smem:[#allocation20_spill]]  ;;  %v2841_v18 = vmov 0.0   ;;  %vm717_vm6 = vcmask 261120   ;;  %vm720_vm7 = vcmask 523264  }
  0x45   : > { %p622_p6 = scmp.lt.s32.totalorder %s2188_s27, 3  ;;  %s3680_s20 = sld [smem:[#allocation18_spill]]  ;;  %vm742_vm8 = vcmask 785408   ;;  %v2198_v50 = vld [vmem:[%s3632_s5] ss:$0 sm:$0xff]  ;;  %vm1365_vm12 = vcmask 121856  }
  0x46   : > { %v3042_v6 = vshrl.u32 %v646_v0, 7  ;;  %s2843_s19 = smov 96   ;;  %s1340_s25 = sld [smem:[#allocation2]]  ;;  %vm1400_vm14 = vcmask 130048  }
  0x47   : > { %s3694_s27 = smov (!%p622_p6, %s2188_s27), 3  ;;  %s3681_s3 = sld [smem:[#allocation19_spill]] }
  0x48   : > { %v653_v10 = vand.u32 7, %v3042_v6  ;;  %v648_v11 = vadd.s32 8, %v3042_v6  ;;  %s3052_s24 = sshll.u32 %s3694_s27, 3  ;;  %vm696_vm1 = vcmp.lt.s32.totalorder %v3042_v6, 7  ;;  %s3654_s27 = smov 32   ;;  %vm689_vm4 = vcmp.lt.s32.totalorder %v3042_v6, 1 }
  0x49   : > { %s2270_s1 = sld [smem:[#allocation5 + $0x2]]  ;;  %s2271_s23 = sld [smem:[#allocation2 + $0x1]] }
  0x4a   : > { %v723_v1 = vld [vmem:[%s3679_s4] sm:$0xff]  ;;  %v724_v2 = vld [vmem:[%s3679_s4 + $0x8] sm:$0xff]  ;;  %v725_v3 = vld [vmem:[%s3679_s4 + $0x10] sm:$0xff]  ;;  %vm679_vm0 = vcmp.ne.s32.totalorder %v653_v10, 7  ;;  %v660_v13 = vand.u32 7, %v648_v11  ;;  %vm673_vm3 = vcmp.ne.s32.totalorder %v653_v10, 0 }
  0x4b   : > { %v2513_v4 = vpack.c.bf16 %v724_v2, %v723_v1  ;;  %v726_v5 = vld [vmem:[%s3679_s4 + $0x18] sm:$0xff]  ;;  %v727_v8 = vld [vmem:[%s3679_s4 + $0x20] sm:$0xff]  ;;  %v728_v9 = vld [vmem:[%s3679_s4 + $0x28] sm:$0xff]  ;;  %s625_s21 = scalar_lea.vmem %s3680_s20, %s3052_s24  ;;  %v3072_v19 = vsel %vm679_vm0, 1.0, %v2841_v18  ;;  %v3105_v36 = vsel %vm673_vm3, 1.0, %v2841_v18  ;;  %s2285_s29 = sshll.u32 %s2966_s0, 8 }
  0x4c   : > { %v2517_v7 = vpack.c.bf16 %v726_v5, %v725_v3  ;;  %v2521_v12 = vpack.c.bf16 %v728_v9, %v727_v8  ;;  %v729_v14 = vld [vmem:[%s3679_s4 + $0x30] sm:$0xff]  ;;  %v730_v15 = vld [vmem:[%s3679_s4 + $0x38] sm:$0xff]  ;;  %v3064_v16 = vld [vmem:[%s625_s21] sm:$0xff]  ;;  %vm680_vm2 = vcmp.ne.s32.totalorder %v660_v13, 7  ;;  %vm674_vm5 = vcmp.ne.s32.totalorder %v660_v13, 0  ;;  %p3684_p12 = scmp.ne.s32.totalorder %s3667_s2, 0 }
  0x4d   : > { %2514 = vmatprep.subr.bf16.mxu0 %v2513_v4  ;;  %v3066_v17 = vld [vmem:[%s625_s21 + $0x8] sm:$0xff]  ;;  %703 = vrot.lane.b32.xlu0 %v3064_v16, %s3654_s27  ;;  %v694_v20 = vrot.slane %v3064_v16, 1  ;;  %v2525_v22 = vpack.c.bf16 %v730_v15, %v729_v14  ;;  %v3079_v24 = vsel %vm680_vm2, 1.0, %v2841_v18  ;;  %v731_v26 = vld [vmem:[%s3679_s4 + $0x40] sm:$0xff]  ;;  %s3656_s21 = smov 64   ;;  %v733_v31 = vld [vmem:[%s3679_s4 + $0x50] sm:$0xff]  ;;  %s631_s26 = scalar_lea.vmem %s3681_s3, %s3052_s24 }
  0x4e   : > { %2516 = vmatpush3.bf16.msra.mxu0 %v2513_v4  ;;  %v695_v21 = vrot.slane %v3066_v17, 1  ;;  %v732_v27 = vld [vmem:[%s3679_s4 + $0x48] sm:$0xff]  ;;  %v734_v32 = vld [vmem:[%s3679_s4 + $0x58] sm:$0xff]  ;;  %v688_v34 = vrot.slane %v3066_v17, 7  ;;  %v687_v35 = vrot.slane %v3064_v16, 7  ;;  %v3111_v40 = vsel %vm674_vm5, 1.0, %v2841_v18 }
  0x4f   : > { %2518 = vmatprep.subr.bf16.mxu0 %v2517_v7  ;;  %v2529_v30 = vpack.c.bf16 %v732_v27, %v731_v26  ;;  %v2533_v33 = vpack.c.bf16 %v734_v32, %v733_v31  ;;  %v2206_v11 = vld [vmem:[%s3636_s9 + $0x1] ss:$0 sm:$0xff]  ;;  %v2214_v27 = vld [vmem:[%s3637_s10 + $0x68] sm:$0xff]  ;;  %v2216_v32 = vld [vmem:[%s3637_s10 + $0x78] sm:$0xff]  ;;  %s2847_s3 = smov [#allocation7]  }
  0x50   : > { %v697_v23 = vsel %vm696_vm1, %v694_v20, %v695_v21  ;;  %v698_v25 = vsel %vm696_vm1, %v695_v21, %v694_v20  ;;  %v691_v37 = vsel %vm689_vm4, %v688_v34, %v687_v35  ;;  %v690_v41 = vsel %vm689_vm4, %v687_v35, %v688_v34  ;;  %v2213_v26 = vld [vmem:[%s3637_s10 + $0x60] sm:$0xff] }
  0x51   : > { %v699_v28 = vmul.f32 %v3072_v19, %v697_v23  ;;  %705 = vrot.lane.b32.xlu0 %v3066_v17, %s3654_s27  ;;  %v700_v29 = vmul.f32 %v3079_v24, %v698_v25  ;;  %v692_v38 = vmul.f32 %v3105_v36, %v691_v37  ;;  %v693_v43 = vmul.f32 %v3111_v40, %v690_v41  ;;  %v2217_v37 = vld [vmem:[%s3637_s10 + $0x80] sm:$0xff] }
  0x52   : > { %2520 = vmatpush3.bf16.msra.mxu0 %v2517_v7  ;;  %v2561_v31 = vpack.c.bf16 %v2214_v27, %v2213_v26 }
  0x53   : > { %2522 = vmatprep.subr.bf16.mxu0 %v2521_v12  ;;  %711 = vrot.lane.b32.xlu1 %v699_v28, %s3656_s21  ;;  %v2215_v28 = vld [vmem:[%s3637_s10 + $0x70] sm:$0xff] }
  0x54   : > { %v2565_v35 = vpack.c.bf16 %v2216_v32, %v2215_v28 }
  0x56   : > { %2524 = vmatpush3.bf16.msra.mxu0 %v2521_v12  ;;  %v2205_v12 = vld [vmem:[%s3635_s8 + $0x1] ss:$0 sm:$0xff] }
  0x57   : > { %2526 = vmatprep.subr.bf16.mxu0 %v2525_v22  ;;  %713 = vrot.lane.b32.xlu1 %v700_v29, %s3656_s21 }
  0x5a   : > { %2528 = vmatpush3.bf16.msra.mxu0 %v2525_v22 }
  0x5b   : > { %2530 = vmatprep.subr.bf16.mxu0 %v2529_v30 }
  0x5e   : > { %2532 = vmatpush3.bf16.msra.mxu0 %v2529_v30 }
  0x5f   : > { %2534 = vmatprep.subr.bf16.mxu0 %v2533_v33 }
  0x62   : > { %2536 = vmatpush3.bf16.msra.mxu0 %v2533_v33 }
  0x63   : > { %2562 = vmatprep.subr.bf16.mxu0 %v2561_v31 }
  0xbf   : > { %v704_v39 = vpop.permute.xlu0 %703 }
  0xc0   : > { %v718_v42 = vsel %vm717_vm6, %v692_v38, %v704_v39  ;;  %v2218_v38 = vld [vmem:[%s3637_s10 + $0x88] sm:$0xff] }
  0xc3   : > { %v706_v44 = vpop.permute.xlu0 %705 }
  0xc4   : > { %v719_v47 = vsel %vm717_vm6, %v693_v43, %v706_v44  ;;  %v2569_v43 = vpack.c.bf16 %v2218_v38, %v2217_v37 }
  0xc5   : > { %v712_v45 = vpop.permute.xlu1 %711 }
  0xc6   : > { %v721_v46 = vsel %vm720_vm7, %v718_v42, %v712_v45  ;;  %v2219_v45 = vld [vmem:[%s3637_s10 + $0x90] sm:$0xff] }
  0xc7   : > { %2388 = vmatprep.mubr.msk.f32.mxu0 %vm742_vm8, %v721_v46  ;;  %v2220_v46 = vld [vmem:[%s3637_s10 + $0x98] sm:$0xff] }
  0xc9   : > { %v714_v48 = vpop.permute.xlu1 %713 }
  0xca   : > { %v722_v49 = vsel %vm720_vm7, %v719_v47, %v714_v48  ;;  %v2573_v47 = vpack.c.bf16 %v2220_v46, %v2219_v45  ;;  %v2221_v48 = vld [vmem:[%s3637_s10 + $0xa0] sm:$0xff] }
  0xcb   : > { %2389 = vmatmul.mubr.msk.f32.vlgmr.msra.gmra.mrb[0].mxu0 %vm742_vm8, %v722_v49  ;;  %v2222_v49 = vld [vmem:[%s3637_s10 + $0xa8] sm:$0xff] }
  0xcc   : > { %2564 = vmatpush3.bf16.msra.mxu0 %v2561_v31 }
  0xcd   : > { %2566 = vmatprep.subr.bf16.mxu0 %v2565_v35 }
  0xd0   : > { %2568 = vmatpush3.bf16.msra.mxu0 %v2565_v35 }
  0xd1   : > { %2570 = vmatprep.subr.bf16.mxu0 %v2569_v43 }
  0xd4   : > { %2572 = vmatpush3.bf16.msra.mxu0 %v2569_v43 }
  0xd5   : > { %2574 = vmatprep.subr.bf16.mxu0 %v2573_v47 }
  0xd8   : > { %2576 = vmatpush3.bf16.msra.mxu0 %v2573_v47 }
 0x19e   : > { %v2390_v51 = vpop.f32.mrb[0].mxu0 }
 0x19f   : > { %v821_v52 = vadd.f32 %v2390_v51, %v2198_v50  ;;  %v815_v53 = vpop.f32.mrb[1].mxu0  ;;  %v2223_v51 = vld [vmem:[%s3637_s10 + $0xb0] sm:$0xff] }
 0x1a0   : > { %v816_v54 = vadd.f32 %v2198_v50, %v815_v53  ;;  %v2577_v50 = vpack.c.bf16 %v2222_v49, %v2221_v48 }
 0x1a1   : > { %v3125_v55 = vmax.f32 %v821_v52, 0.0  ;;  %v2224_v52 = vld [vmem:[%s3637_s10 + $0xb8] sm:$0xff] }
 0x1a2   : > { %v3127_v56 = vmax.f32 %v816_v54, 0.0  ;;  %2578 = vmatprep.subr.bf16.mxu0 %v2577_v50  ;;  %v2581_v53 = vpack.c.bf16 %v2224_v52, %v2223_v51 }
 0x1a3   : > { %879 = vrot.lane.b32.xlu1 %v3125_v55, %s2843_s19  ;;  %2580 = vmatpush3.bf16.msra.mxu0 %v2577_v50  ;;  %v2231_v50 = vld [vmem:[%s3639_s12 + $0x1] ss:$0 sm:$0xff] }
 0x1a4   : > { %877 = vrot.lane.b32.xlu0 %v3127_v56, %s2843_s19  ;;  %2582 = vmatprep.subr.bf16.mxu0 %v2581_v53  ;;  %v828_v28 = vsel %vm717_vm6, %v3127_v56, 0.0 }
 0x1a7   : > { %2584 = vmatpush3.bf16.msra.mxu0 %v2581_v53 }
 0x215   : > { %v880_v57 = vpop.permute.xlu1 %879 }
 0x216   : > { %v878_v58 = vpop.permute.xlu0 %877  ;;  %v886_v59 = vsel %vm717_vm6, %v880_v57, 0.0 }
 0x217   : > { %887 = vadd.xlane.f32.xlu1 %v886_v59  ;;  %v883_v60 = vsel %vm717_vm6, %v878_v58, 0.0 }
 0x218   : > { %884 = vadd.xlane.f32.xlu0 %v883_v60 }
 0x2a4   : > { %v888_v61 = vpop.xlane.xlu1 %887 }
 0x2a5   : > { %v890_v62 = vmul.f32 0.03125, %v888_v61  ;;  %v885_v63 = vpop.xlane.xlu0 %884 }
 0x2a6   : > { %v889_v1 = vmul.f32 0.03125, %v885_v63 }
 0x2a7   : > { %v892_v2 = vsub.f32 %v3125_v55, %v890_v62 }
 0x2a8   : > { %v891_v3 = vsub.f32 %v3127_v56, %v889_v1 }
 0x2a9   : > { %v894_v4 = vmul.f32 %v892_v2, %v892_v2 }
 0x2aa   : > { %v893_v5 = vmul.f32 %v891_v3, %v891_v3 }
 0x2ab   : > { %899 = vrot.lane.b32.xlu1 %v894_v4, %s2843_s19 }
 0x2ac   : > { %897 = vrot.lane.b32.xlu0 %v893_v5, %s2843_s19 }
 0x31d   : > { %v900_v7 = vpop.permute.xlu1 %899 }
 0x31e   : > { %v898_v8 = vpop.permute.xlu0 %897  ;;  %v906_v9 = vsel %vm717_vm6, %v900_v7, 0.0 }
 0x31f   : > { %907 = vadd.xlane.f32.xlu1 %v906_v9  ;;  %v903_v10 = vsel %vm717_vm6, %v898_v8, 0.0 }
 0x320   : > { %904 = vadd.xlane.f32.xlu0 %v903_v10 }
 0x330   : > { %932 = vrot.lane.b32.xlu1 %v2206_v11, %s3654_s27 }
 0x336   : > { %922 = vrot.lane.b32.xlu0 %v2205_v12, %s3654_s27 }
 0x3ac   : > { %v908_v13 = vpop.xlane.xlu1 %907 }
 0x3ad   : > { %v910_v14 = vmul.f32 0.03125, %v908_v13  ;;  %v905_v15 = vpop.xlane.xlu0 %904 }
 0x3ae   : > { %v909_v20 = vmul.f32 0.03125, %v905_v15 }
 0x3af   : > { %v912_v21 = vadd.f32 1e-05, %v910_v14  ;;  %v2226_v14 = vld [vmem:[%s3638_s11 + $0x1] ss:$0 sm:$0xff] }
 0x3b0   : > { %v911_v22 = vadd.f32 1e-05, %v909_v20  ;;  %v933_v34 = vpop.permute.xlu1 %932 }
 0x3b1   : > { %2712 = vrsqrt.f32 %v912_v21  ;;  %v923_v25 = vpop.permute.xlu0 %922 }
 0x3b2   : > { %2714 = vrsqrt.f32 %v911_v22 }
 0x3bb   : > { %v2713_v23 = vpop.eup %2712 }
 0x3bc   : > { %v2715_v29 = vpop.eup %2714  ;;  %v916_v30 = vmul.f32 %v2713_v23, %v892_v2 }
 0x3bd   : > { %v915_v33 = vmul.f32 %v2715_v29, %v891_v3 }
 0x3be   : > { %v926_v39 = vmul.f32 %v923_v25, %v916_v30 }
 0x3bf   : > { %v925_v41 = vmul.f32 %v923_v25, %v915_v33 }
 0x3c0   : > { %v936_v42 = vadd.f32 %v933_v34, %v926_v39 }
 0x3c1   : > { %v935_v44 = vadd.f32 %v933_v34, %v925_v41  ;;  %v831_v41 = vsel %vm717_vm6, %v3125_v55, 0.0 }
 0x3c2   : > { %1140 = vrot.lane.b32.xlu1 %v936_v42, %s2843_s19 }
 0x3c3   : > { %1138 = vrot.lane.b32.xlu0 %v935_v44, %s2843_s19  ;;  %s2235_s19 = sld [smem:[#allocation5 + $0x1]] }
 0x434   : > { %v1141_v54 = vpop.permute.xlu1 %1140 }
 0x435   : > { %v1151_v57 = vrot.slane %v1141_v54, 1  ;;  %v1139_v58 = vpop.permute.xlu0 %1138  ;;  %v1145_v1 = vrot.slane %v1141_v54, 7  ;;  %v2232_v54 = vld [vmem:[%s3640_s13 + $0x1] ss:$0 sm:$0xff] }
 0x436   : > { %v1150_v59 = vrot.slane %v1139_v58, 1  ;;  %v1144_v2 = vrot.slane %v1139_v58, 7 }
 0x438   : > { %v1153_v60 = vsel %vm696_vm1, %v1151_v57, %v1150_v59  ;;  %v1152_v61 = vsel %vm696_vm1, %v1150_v59, %v1151_v57  ;;  %v1146_v3 = vsel %vm689_vm4, %v1144_v2, %v1145_v1  ;;  %v1147_v4 = vsel %vm689_vm4, %v1145_v1, %v1144_v2  ;;  %v2234_v59 = vld [vmem:[%s3641_s14 + $0x1] ss:$0 sm:$0xff] }
 0x439   : > { %v1155_v62 = vmul.f32 %v3079_v24, %v1153_v60  ;;  %v1154_v63 = vmul.f32 %v3072_v19, %v1152_v61  ;;  %v1148_v5 = vmul.f32 %v3105_v36, %v1147_v4  ;;  %v1149_v7 = vmul.f32 %v3111_v40, %v1146_v3 }
 0x43b   : > { %1160 = vrot.lane.b32.xlu1 %v1155_v62, %s3656_s21  ;;  %1158 = vrot.lane.b32.xlu0 %v1154_v63, %s3656_s21  ;;  %v1165_v9 = vsel %vm717_vm6, %v1149_v7, %v936_v42  ;;  %v1164_v11 = vsel %vm717_vm6, %v1148_v5, %v935_v44 }
 0x4ad   : > { %v1161_v8 = vpop.permute.xlu1 %1160  ;;  %v1159_v10 = vpop.permute.xlu0 %1158 }
 0x4ae   : > { %v1167_v12 = vsel %vm720_vm7, %v1165_v9, %v1161_v8  ;;  %v1166_v13 = vsel %vm720_vm7, %v1164_v11, %v1159_v10 }
 0x4af   : > { %2442 = vmatprep.mubr.msk.f32.mxu0 %vm742_vm8, %v1166_v13  ;;  %v1335_v13 = vstv %s2235_s19  ;;  %s3682_s19 = smov 32  }
 0x4b0   : > { %2443 = vmatmul.mubr.msk.f32.vlgmr.msra.gmra.mrb[2].mxu0 %vm742_vm8, %v1167_v12  ;;  %v2844_v12 = vmov 0  }
 0x4b1   : > { %2710 = vset.pattern.permute.xlu1 %v2844_v12  ;;  %2711 = vset.pattern.permute.xlu0 %v2844_v12 }
 0x583   : > { %v2444_v15 = vpop.f32.mrb[2].mxu0 }
 0x584   : > { %v1267_v20 = vadd.f32 %v2444_v15, %v2226_v14  ;;  %v1261_v21 = vpop.f32.mrb[3].mxu0  ;;  %v1341_v15 = vstv %s1340_s25  ;;  %s3683_s25 = smov 64  }
 0x585   : > { %v1262_v22 = vadd.f32 %v2226_v14, %v1261_v21  ;;  %v3242_v21 = vld [vmem:[%s631_s26 + $0x8] sm:$0xff] }
 0x586   : > { %v1271_v23 = vmax.f32 %v1267_v20, 0.0  ;;  %vm645_vm10 = vcmp.gt.f32.partialorder %v3242_v21, 0.0 }
 0x587   : > { %v1270_v25 = vmax.f32 %v1262_v22, 0.0 }
 0x588   : > { %v1279_v26 = vsel %vm717_vm6, %v1271_v23, 0.0 }
 0x589   : > { %1280 = vadd.xlane.f32.xlu1 %v1279_v26  ;;  %v1276_v27 = vsel %vm717_vm6, %v1270_v25, 0.0 }
 0x58a   : > { %1277 = vadd.xlane.f32.xlu0 %v1276_v27 }
 0x58d   : > { %829 = vadd.xlane.f32.xlu1 %v828_v28 }
 0x616   : > { %v1281_v29 = vpop.xlane.xlu1 %1280 }
 0x617   : > { %v1283_v30 = vmul.f32 0.03125, %v1281_v29  ;;  %v1278_v31 = vpop.xlane.xlu0 %1277 }
 0x618   : > { %v1282_v32 = vmul.f32 0.03125, %v1278_v31 }
 0x619   : > { %v1285_v33 = vsub.f32 %v1271_v23, %v1283_v30 }
 0x61a   : > { %v1284_v34 = vsub.f32 %v1270_v25, %v1282_v32  ;;  %v830_v48 = vpop.xlane.xlu1 %829 }
 0x61b   : > { %v1287_v38 = vmul.f32 %v1285_v33, %v1285_v33  ;;  %v835_v51 = vmul.f32 0.03125, %v830_v48 }
 0x61c   : > { %v1286_v35 = vmul.f32 %v1284_v34, %v1284_v34 }
 0x61d   : > { %v1291_v39 = vsel %vm717_vm6, %v1287_v38, 0.0  ;;  %v837_v60 = vsub.f32 %v3127_v56, %v835_v51 }
 0x61e   : > { %v1288_v37 = vsel %vm717_vm6, %v1286_v35, 0.0 }
 0x61f   : > { %1289 = vadd.xlane.f32.xlu0 %v1288_v37  ;;  %v839_v7 = vmul.f32 %v837_v60, %v837_v60  ;;  %v2201_v37 = vld [vmem:[%s3635_s8] ss:$0 sm:$0xff] }
 0x621   : > { %v841_v10 = vsel %vm717_vm6, %v839_v7, 0.0 }
 0x623   : > { %1292 = vadd.xlane.f32.xlu0 %v1291_v39  ;;  %v2202_v39 = vld [vmem:[%s3636_s9] ss:$0 sm:$0xff] }
 0x627   : > { %832 = vadd.xlane.f32.xlu0 %v831_v41 }
 0x6ac   : > { %v1290_v42 = vpop.xlane.xlu0 %1289 }
 0x6ad   : > { %v1294_v43 = vmul.f32 0.03125, %v1290_v42 }
 0x6af   : > { %v1296_v44 = vadd.f32 1e-05, %v1294_v43 }
 0x6b0   : > { %v1293_v45 = vpop.xlane.xlu0 %1292 }
 0x6b1   : > { %2716 = vrsqrt.f32 %v1296_v44  ;;  %v1295_v46 = vmul.f32 0.03125, %v1293_v45 }
 0x6b3   : > { %v1297_v47 = vadd.f32 1e-05, %v1295_v46 }
 0x6b4   : > { %v833_v53 = vpop.xlane.xlu0 %832 }
 0x6b5   : > { %2718 = vrsqrt.f32 %v1297_v47  ;;  %v836_v61 = vmul.f32 0.03125, %v833_v53 }
 0x6b7   : > { %v838_v3 = vsub.f32 %v3125_v55, %v836_v61  ;;  %v3239_v55 = vld [vmem:[%s631_s26] sm:$0xff]  ;;  %v972_v61 = vld [vmem:[%s3637_s10 + $0x18] sm:$0xff] }
 0x6b8   : > { %vm644_vm9 = vcmp.gt.f32.partialorder %v3239_v55, 0.0 }
 0x6b9   : > { %v840_v11 = vmul.f32 %v838_v3, %v838_v3 }
 0x6bb   : > { %v2717_v49 = vpop.eup %2716  ;;  %v844_v56 = vsel %vm717_vm6, %v840_v11, 0.0 }
 0x6bc   : > { %v1300_v52 = vmul.f32 %v2717_v49, %v1284_v34 }
 0x6be   : > { %v1308_v57 = vmul.f32 %v2231_v50, %v1300_v52 }
 0x6bf   : > { %v2719_v58 = vpop.eup %2718 }
 0x6c0   : > { %v1316_v62 = vadd.f32 %v2232_v54, %v1308_v57  ;;  %v1301_v63 = vmul.f32 %v2719_v58, %v1285_v33  ;;  %v969_v57 = vld [vmem:[%s3637_s10] sm:$0xff]  ;;  %v970_v58 = vld [vmem:[%s3637_s10 + $0x8] sm:$0xff] }
 0x6c2   : > { %v1326_v1 = vmul.f32 %v2234_v59, %v1316_v62  ;;  %v1309_v2 = vmul.f32 %v2231_v50, %v1301_v63  ;;  %v973_v63 = vld [vmem:[%s3637_s10 + $0x20] sm:$0xff] }
 0x6c4   : > { %v1328_v4 = vsel %vm717_vm6, %v1326_v1, 0.0  ;;  %v1317_v5 = vadd.f32 %v2232_v54, %v1309_v2  ;;  %v974_v1 = vld [vmem:[%s3637_s10 + $0x28] sm:$0xff] }
 0x6c5   : > { %1329 = vadd.xlane.f32.xlu1 %v1328_v4  ;;  %v2545_v2 = vpack.c.bf16 %v974_v1, %v973_v63 }
 0x6c6   : > { %v1327_v8 = vmul.f32 %v2234_v59, %v1317_v5  ;;  %v971_v59 = vld [vmem:[%s3637_s10 + $0x10] sm:$0xff] }
 0x6c7   : > { %v2541_v62 = vpack.c.bf16 %v972_v61, %v971_v59 }
 0x6c8   : > { %v1331_v9 = vsel %vm717_vm6, %v1327_v8, 0.0 }
 0x6c9   : > { %1332 = vadd.xlane.f32.xlu0 %v1331_v9  ;;  %842 = vadd.xlane.f32.xlu1 %v841_v10 }
 0x6cd   : > { %845 = vadd.xlane.f32.xlu0 %v844_v56 }
 0x752   : > { %v1330_v14 = vpop.xlane.xlu1 %1329 }
 0x753   : > { %v1336_v20 = vadd.f32 %v1335_v13, %v1330_v14 }
 0x755   : > { %v1338_v22 = vsel %vm644_vm9, 0.0, %v1336_v20 }
 0x756   : > { %v3246_v23 = vmul.f32 %v1341_v15, %v1338_v22  ;;  %v1333_v25 = vpop.xlane.xlu0 %1332  ;;  %v843_v26 = vpop.xlane.xlu1 %842 }
 0x757   : > { %v1337_v27 = vadd.f32 %v1335_v13, %v1333_v25  ;;  %v847_v28 = vmul.f32 0.03125, %v843_v26 }
 0x758   : > { %1347 = vperm.xlu1 %2710, %v3246_v23  }
 0x759   : > { %v1339_v29 = vsel %vm645_vm10, 0.0, %v1337_v27  ;;  %v849_v30 = vadd.f32 1e-05, %v847_v28 }
 0x75a   : > { %v3252_v31 = vmul.f32 %v1341_v15, %v1339_v29  ;;  %v846_v32 = vpop.xlane.xlu0 %845 }
 0x75b   : > { %2720 = vrsqrt.f32 %v849_v30  ;;  %v848_v33 = vmul.f32 0.03125, %v846_v32 }
 0x75c   : > { %1352 = vperm.xlu0 %2711, %v3252_v31  }
 0x75d   : > { %v850_v34 = vadd.f32 1e-05, %v848_v33  ;;  %v975_v33 = vld [vmem:[%s3637_s10 + $0x30] sm:$0xff] }
 0x75f   : > { %2722 = vrsqrt.f32 %v850_v34  ;;  %v976_v34 = vld [vmem:[%s3637_s10 + $0x38] sm:$0xff] }
 0x765   : > { %v2721_v35 = vpop.eup %2720 }
 0x766   : > { %v853_v38 = vmul.f32 %v2721_v35, %v837_v60  ;;  %v2537_v60 = vpack.c.bf16 %v970_v58, %v969_v57  ;;  %v2549_v35 = vpack.c.bf16 %v976_v34, %v975_v33 }
 0x768   : > { %v861_v41 = vmul.f32 %v2201_v37, %v853_v38  ;;  %2538 = vmatprep.subr.bf16.mxu1 %v2537_v60  ;;  %v978_v38 = vld [vmem:[%s3637_s10 + $0x48] sm:$0xff] }
 0x769   : > { %v2723_v42 = vpop.eup %2722  ;;  %2540 = vmatpush3.bf16.msra.mxu1 %v2537_v60 }
 0x76a   : > { %v854_v43 = vmul.f32 %v2723_v42, %v838_v3  ;;  %v869_v44 = vadd.f32 %v2202_v39, %v861_v41  ;;  %2542 = vmatprep.subr.bf16.mxu1 %v2541_v62  ;;  %v2236_v3 = vld [vmem:[%s3642_s15] ss:$0 sm:$0xff]  ;;  %v979_v41 = vld [vmem:[%s3637_s10 + $0x50] sm:$0xff]  ;;  %v980_v42 = vld [vmem:[%s3637_s10 + $0x58] sm:$0xff] }
 0x76c   : > { %v862_v45 = vmul.f32 %v2201_v37, %v854_v43  ;;  %951 = vrot.lane.b32.xlu1 %v869_v44, %s3682_s19  ;;  %v937_v48 = vrot.slane %v869_v44, 7  ;;  %v943_v49 = vrot.slane %v869_v44, 1  ;;  %v977_v37 = vld [vmem:[%s3637_s10 + $0x40] sm:$0xff]  ;;  %v2557_v43 = vpack.c.bf16 %v980_v42, %v979_v41 }
 0x76d   : > { %2544 = vmatpush3.bf16.msra.mxu1 %v2541_v62  ;;  %v3336_v62 = vand.u32 127, %v646_v0 }
 0x76e   : > { %v3262_v46 = vadd.f32 %v2202_v39, %v862_v45  ;;  %2546 = vmatprep.subr.bf16.mxu1 %v2545_v2  ;;  %v2553_v39 = vpack.c.bf16 %v978_v38, %v977_v37  ;;  %v1398_v45 = vld [vmem:[%s3643_s16] sm:$0xff] }
 0x770   : > { %v938_v47 = vrot.slane %v3262_v46, 7  ;;  %v944_v50 = vrot.slane %v3262_v46, 1 }
 0x771   : > { %2548 = vmatpush3.bf16.msra.mxu1 %v2545_v2 }
 0x772   : > { %v945_v51 = vsel %vm696_vm1, %v943_v49, %v944_v50  ;;  %v946_v52 = vsel %vm696_vm1, %v944_v50, %v943_v49  ;;  %v3272_v53 = vsel %vm689_vm4, %v937_v48, %v938_v47  ;;  %v940_v20 = vsel %vm689_vm4, %v938_v47, %v937_v48  ;;  %2550 = vmatprep.subr.bf16.mxu1 %v2549_v35  ;;  %v1399_v47 = vld [vmem:[%s3643_s16 + $0x8] sm:$0xff] }
 0x773   : > { %v947_v54 = vmul.f32 %v3072_v19, %v945_v51  ;;  %v941_v25 = vmul.f32 %v3105_v36, %v940_v20  ;;  %v948_v44 = vmul.f32 %v3079_v24, %v946_v52  ;;  %v2585_v48 = vpack.c.bf16 %v1399_v47, %v1398_v45  ;;  %v1522_v20 = vld [vmem:[%s3633_s6 + $0x30] sm:$0xff] }
 0x774   : > { %v942_v1 = vmul.f32 %v3111_v40, %v3272_v53 }
 0x775   : > { %959 = vrot.lane.b32.xlu1 %v947_v54, %s3656_s21  ;;  %2552 = vmatpush3.bf16.msra.mxu1 %v2549_v35  ;;  %s618_s21 = sand.u32 1, %s2828_s28  }
 0x776   : > { %2554 = vmatprep.subr.bf16.mxu1 %v2553_v39  ;;  %s2187_s20 = sshll.u32 %s618_s21, 4  ;;  %s3578_s0 = scalar_lea.sflag [#allocation3], %s618_s21 }
 0x777   : > { %s620_s4 = scalar_lea.vmem [#allocation7], %s2187_s20 }
 0x778   : > { %s2058_s27 = sshll.u32 %s620_s4, 4  ;;  %s3568_s27 = int_to_ptr.vmem [resolvable:$true] %s2058_s27 }
 0x779   : > { %2556 = vmatpush3.bf16.msra.mxu1 %v2553_v39  ;;  %s2766_s26 = scalar_lea.vmem %s3568_s27, 256 }
 0x77a   : > { %2558 = vmatprep.subr.bf16.mxu1 %v2557_v43  ;;  %p2767_p10 = scmp.ne.s32.totalorder %s3568_s27, %s2766_s26 }
 0x77c   : > { %p2768_p0 = pnand %p2767_p10, %p3684_p12 }
 0x77d   : > { %2560 = vmatpush3.bf16.msra.mxu1 %v2557_v43 }
 0x77e   : > { %2586 = vmatprep.subr.bf16.mxu1 %v2585_v48  ;;  %p2769_p7 = pneg %p2768_p0 }
 0x7d7   : > { %v1348_v4 = vpop.permute.xlu1 %1347 }
 0x7d8   : > { %vm1361_vm11 = vcmp.gt.f32.partialorder %v1348_v4, %v2236_v3 }
 0x7d9   : > { %v1363_v5 = vsel %vm1361_vm11, 1, %v2844_v12 }
 0x7da   : > { %v1366_v9 = vsel %vm1365_vm12, %v1363_v5, 0 }
 0x7db   : > { %v1353_v7 = vpop.permute.xlu0 %1352  ;;  %v1368_v15 = vshrl.u32 %v1366_v9, 16  ;;  %v1367_v27 = vand.u32 65535, %v1366_v9  ;;  %v1518_v9 = vld [vmem:[%s3633_s6 + $0x10] sm:$0xff] }
 0x7dc   : > { %vm1362_vm13 = vcmp.gt.f32.partialorder %v1353_v7, %v2236_v3  ;;  %v1516_v7 = vld [vmem:[%s3633_s6] sm:$0xff] }
 0x7dd   : > { %v1364_v8 = vsel %vm1362_vm13, 1, %v2844_v12  ;;  %v1370_v26 = vcvt.s32.f32 %v1368_v15  ;;  %v1369_v32 = vcvt.s32.f32 %v1367_v27  ;;  %v1525_v27 = vld [vmem:[%s3633_s6 + $0x48] sm:$0xff] }
 0x7de   : > { %v1379_v10 = vsel %vm1365_vm12, %v1364_v8, 0  ;;  %v952_v22 = vpop.permute.xlu1 %951  ;;  %v1517_v8 = vld [vmem:[%s3633_s6 + $0x8] sm:$0xff] }
 0x7df   : > { %v1381_v11 = vshrl.u32 %v1379_v10, 16  ;;  %v1380_v56 = vand.u32 65535, %v1379_v10  ;;  %v965_v28 = vsel %vm717_vm6, %v941_v25, %v952_v22  ;;  %v2589_v10 = vpack.c.bf16 %v1517_v8, %v1516_v7  ;;  %v1523_v22 = vld [vmem:[%s3633_s6 + $0x38] sm:$0xff] }
 0x7e0   : > { %v2601_v25 = vpack.c.bf16 %v1523_v22, %v1522_v20 }
 0x7e1   : > { %v1383_v13 = vcvt.s32.f32 %v1381_v11  ;;  %v1382_v14 = vcvt.s32.f32 %v1380_v56  ;;  %v1519_v11 = vld [vmem:[%s3633_s6 + $0x18] sm:$0xff] }
 0x7e2   : > { %v2593_v56 = vpack.c.bf16 %v1519_v11, %v1518_v9 }
 0x7e3   : > { %1386 = vadd.xlane.f32.xlu0 %v1383_v13  ;;  %1384 = vadd.xlane.f32.xlu1 %v1382_v14  ;;  %v1520_v13 = vld [vmem:[%s3633_s6 + $0x20] sm:$0xff]  ;;  %v1521_v14 = vld [vmem:[%s3633_s6 + $0x28] sm:$0xff] }
 0x7e4   : > { %v2597_v15 = vpack.c.bf16 %v1521_v14, %v1520_v13 }
 0x7e7   : > { %1373 = vadd.xlane.f32.xlu1 %v1370_v26  ;;  %v960_v29 = vpop.permute.xlu1 %959  ;;  %v1524_v26 = vld [vmem:[%s3633_s6 + $0x40] sm:$0xff] }
 0x7e8   : > { %v967_v30 = vsel %vm720_vm7, %v965_v28, %v960_v29  ;;  %v2605_v28 = vpack.c.bf16 %v1525_v27, %v1524_v26  ;;  %v2249_v26 = vld [vmem:[%s3637_s10 + $0xc8] sm:$0xff]  ;;  %v2250_v27 = vld [vmem:[%s3637_s10 + $0xd0] sm:$0xff] }
 0x7e9   : > { %2415 = vmatprep.mubr.msk.f32.mxu1 %vm742_vm8, %v967_v30  ;;  %v1526_v30 = vld [vmem:[%s3633_s6 + $0x50] sm:$0xff] }
 0x7eb   : > { %1371 = vadd.xlane.f32.xlu1 %v1369_v32  ;;  %v1527_v32 = vld [vmem:[%s3633_s6 + $0x58] sm:$0xff] }
 0x7ec   : > { %v2609_v34 = vpack.c.bf16 %v1527_v32, %v1526_v30  ;;  %v2251_v30 = vld [vmem:[%s3637_s10 + $0xd8] sm:$0xff] }
 0x7ed   : > { %v2617_v32 = vpack.c.bf16 %v2251_v30, %v2250_v27 }
 0x7f9   : > { %953 = vrot.lane.b32.xlu0 %v3262_v46, %s3682_s19 }
 0x7fc   : > { %961 = vrot.lane.b32.xlu1 %v948_v44, %s3683_s25 }
 0x870   : > { %v1387_v49 = vpop.xlane.xlu0 %1386  ;;  %v1385_v50 = vpop.xlane.xlu1 %1384 }
 0x871   : > { %v1389_v51 = vcvt.f32.s32 %v1387_v49  ;;  %v1388_v57 = vcvt.f32.s32 %v1385_v50 }
 0x873   : > { %v1390_v52 = vshll.u32 %v1389_v51, 16 }
 0x874   : > { %v1374_v46 = vpop.xlane.xlu1 %1373  ;;  %v954_v59 = vpop.permute.xlu0 %953 }
 0x875   : > { %v1376_v54 = vcvt.f32.s32 %v1374_v46  ;;  %v1391_v63 = vadd.s32 %v1390_v52, %v1388_v57  ;;  %v966_v3 = vsel %vm717_vm6, %v942_v1, %v954_v59 }
 0x877   : > { %v1377_v60 = vshll.u32 %v1376_v54, 16  ;;  %vm1393_vm0 = vcmp.eq.s32.totalorder %v1391_v63, %v3336_v62  ;;  %v2241_v63 = vld [vmem:[%s3634_s7] ss:$0 sm:$0xff] }
 0x878   : > { %v1372_v58 = vpop.xlane.xlu1 %1371  ;;  %v2238_v53 = vsel %vm1393_vm0, 1.0, %v2841_v18 }
 0x879   : > { %v1375_v61 = vcvt.f32.s32 %v1372_v58 }
 0x87b   : > { %v1378_v2 = vadd.s32 %v1377_v60, %v1375_v61 }
 0x87c   : > { %v962_v4 = vpop.permute.xlu1 %961 }
 0x87d   : > { %v968_v5 = vsel %vm720_vm7, %v966_v3, %v962_v4  ;;  %vm1392_vm15 = vcmp.eq.s32.totalorder %v1378_v2, %v3336_v62 }
 0x87e   : > { %2416 = vmatmul.mubr.msk.f32.vlgmr.msra.gmra.mrb[0].mxu1 %vm742_vm8, %v968_v5  ;;  %v2237_v0 = vsel %vm1392_vm15, 1.0, %v2841_v18 }
 0x87f   : > { %2588 = vmatpush3.bf16.msra.mxu1 %v2585_v48  ;;  %2449 = vmatprep.mubr.msk.f32.mxu1 %vm1400_vm14, %v2237_v0 }
 0x880   : > { %2590 = vmatprep.subr.bf16.mxu1 %v2589_v10 }
 0x882   : > { %2450 = vmatmul.mubr.msk.f32.vlgmr.msra.gmra.mrb[2].mxu1 %vm1400_vm14, %v2238_v53 }
 0x883   : > { %2592 = vmatpush3.bf16.msra.mxu1 %v2589_v10 }
 0x884   : > { %2594 = vmatprep.subr.bf16.mxu1 %v2593_v56 }
 0x887   : > { %2596 = vmatpush3.bf16.msra.mxu1 %v2593_v56 }
 0x888   : > { %2598 = vmatprep.subr.bf16.mxu1 %v2597_v15 }
 0x88b   : > { %2600 = vmatpush3.bf16.msra.mxu1 %v2597_v15 }
 0x88c   : > { %2602 = vmatprep.subr.bf16.mxu1 %v2601_v25 }
 0x88f   : > { %2604 = vmatpush3.bf16.msra.mxu1 %v2601_v25  ;;  %v2248_v25 = vld [vmem:[%s3637_s10 + $0xc0] sm:$0xff] }
 0x890   : > { %2606 = vmatprep.subr.bf16.mxu1 %v2605_v28 }
 0x893   : > { %2608 = vmatpush3.bf16.msra.mxu1 %v2605_v28  ;;  %v2613_v28 = vpack.c.bf16 %v2249_v26, %v2248_v25 }
 0x894   : > { %2610 = vmatprep.subr.bf16.mxu1 %v2609_v34 }
 0x895   : > { %2614 = vmatprep.subr.bf16.mxu0 %v2613_v28 }
 0x896   : > { %2616 = vmatpush3.bf16.msra.mxu0 %v2613_v28 }
 0x897   : > { %2612 = vmatpush3.bf16.msra.mxu1 %v2609_v34  ;;  %v2252_v34 = vld [vmem:[%s3637_s10 + $0xe0] sm:$0xff]  ;;  %2618 = vmatprep.subr.bf16.mxu0 %v2617_v32 }
 0x89a   : > { %2620 = vmatpush3.bf16.msra.mxu0 %v2617_v32 }
 0x951   : > { %v3379_v29 = vpop.f32.mrb[0].mxu1 }
 0x952   : > { %v3387_v33 = vpop.f32.mrb[1].mxu1 }
 0x955   : > { %v2451_v35 = vpop.f32.mrb[2].mxu1 }
 0x956   : > { %v3390_v37 = vadd.f32 %v2451_v35, %v3066_v17  ;;  %v1473_v38 = vpop.f32.mrb[3].mxu1  ;;  %v2253_v35 = vld [vmem:[%s3637_s10 + $0xe8] sm:$0xff] }
 0x957   : > { %v3393_v39 = vadd.f32 %v1473_v38, %v3064_v16  ;;  %v2621_v38 = vpack.c.bf16 %v2253_v35, %v2252_v34 }
 0x958   : > { %v1491_v41 = vrot.slane %v3390_v37, 1  ;;  %1500 = vrot.lane.b32.xlu1 %v3390_v37, %s3682_s19  ;;  %v1485_v45 = vrot.slane %v3390_v37, 7 }
 0x959   : > { %v1490_v42 = vrot.slane %v3393_v39, 1  ;;  %v1484_v47 = vrot.slane %v3393_v39, 7  ;;  %2622 = vmatprep.subr.bf16.mxu0 %v2621_v38 }
 0x95a   : > { %2624 = vmatpush3.bf16.msra.mxu0 %v2621_v38 }
 0x95b   : > { %v1492_v43 = vsel %vm696_vm1, %v1490_v42, %v1491_v41  ;;  %v1493_v44 = vsel %vm696_vm1, %v1491_v41, %v1490_v42  ;;  %v1487_v49 = vsel %vm689_vm4, %v1485_v45, %v1484_v47  ;;  %v1486_v46 = vsel %vm689_vm4, %v1484_v47, %v1485_v45  ;;  %v2254_v45 = vld [vmem:[%s3637_s10 + $0xf0] sm:$0xff]  ;;  %v2255_v47 = vld [vmem:[%s3637_s10 + $0xf8] sm:$0xff] }
 0x95c   : > { %1498 = vrot.lane.b32.xlu1 %v3393_v39, %s3682_s19  ;;  %v1494_v17 = vmul.f32 %v3072_v19, %v1492_v43  ;;  %v1495_v16 = vmul.f32 %v3079_v24, %v1493_v44  ;;  %v1488_v51 = vmul.f32 %v3105_v36, %v1487_v49  ;;  %v1489_v58 = vmul.f32 %v3111_v40, %v1486_v46  ;;  %v2256_v49 = vld [vmem:[%s3637_s10 + $0x100] sm:$0xff] }
 0x960   : > { %1506 = vrot.lane.b32.xlu1 %v1494_v17, %s3683_s25 }
 0x964   : > { %1508 = vrot.lane.b32.xlu1 %v1495_v16, %s3683_s25 }
 0x9ca   : > { %v1501_v48 = vpop.permute.xlu1 %1500 }
 0x9cb   : > { %v1513_v59 = vsel %vm717_vm6, %v1489_v58, %v1501_v48  ;;  %v2625_v48 = vpack.c.bf16 %v2255_v47, %v2254_v45  ;;  %v2259_v58 = vld [vmem:[%s3637_s10 + $0x118] sm:$0xff] }
 0x9cd   : > { %2626 = vmatprep.subr.bf16.mxu0 %v2625_v48 }
 0x9ce   : > { %v1499_v50 = vpop.permute.xlu1 %1498  ;;  %2628 = vmatpush3.bf16.msra.mxu0 %v2625_v48 }
 0x9cf   : > { %v1512_v54 = vsel %vm717_vm6, %v1488_v51, %v1499_v50  ;;  %v2257_v50 = vld [vmem:[%s3637_s10 + $0x108] sm:$0xff] }
 0x9d0   : > { %v2629_v51 = vpack.c.bf16 %v2257_v50, %v2256_v49 }
 0x9d2   : > { %v1507_v52 = vpop.permute.xlu1 %1506  ;;  %2630 = vmatprep.subr.bf16.mxu0 %v2629_v51 }
 0x9d3   : > { %v1514_v57 = vsel %vm720_vm7, %v1512_v54, %v1507_v52  ;;  %v2246_v54 = vld [vmem:[%s3635_s8 + $0x2] ss:$0 sm:$0xff]  ;;  %2632 = vmatpush3.bf16.msra.mxu0 %v2629_v51 }
 0x9d4   : > { %2476 = vmatprep.mubr.msk.f32.mxu1 %vm742_vm8, %v1514_v57  ;;  %v2258_v57 = vld [vmem:[%s3637_s10 + $0x110] sm:$0xff] }
 0x9d6   : > { %v1509_v60 = vpop.permute.xlu1 %1508 }
 0x9d7   : > { %v1515_v61 = vsel %vm720_vm7, %v1513_v59, %v1509_v60  ;;  %v2247_v59 = vld [vmem:[%s3636_s9 + $0x2] ss:$0 sm:$0xff]  ;;  %v2633_v60 = vpack.c.bf16 %v2259_v58, %v2258_v57 }
 0x9d8   : > { %2477 = vmatmul.mubr.msk.f32.vlgmr.msra.gmra.mrb[4].mxu1 %vm742_vm8, %v1515_v61 }
 0x9d9   : > { %2634 = vmatprep.subr.bf16.mxu0 %v2633_v60 }
 0x9da   : > { %2636 = vmatpush3.bf16.msra.mxu0 %v2633_v60  ;;  %v2266_v60 = vld [vmem:[%s3639_s12 + $0x2] ss:$0 sm:$0xff] }
 0xaab   : > { %v2478_v1 = vpop.f32.mrb[4].mxu1 }
 0xaac   : > { %v1613_v2 = vadd.f32 %v2478_v1, %v2241_v63  ;;  %v1607_v3 = vpop.f32.mrb[5].mxu1 }
 0xaad   : > { %v1608_v4 = vadd.f32 %v2241_v63, %v1607_v3 }
 0xaae   : > { %v1617_v5 = vmax.f32 %v1613_v2, 0.0 }
 0xaaf   : > { %v1616_v0 = vmax.f32 %v1608_v4, 0.0 }
 0xab0   : > { %v1625_v53 = vsel %vm717_vm6, %v1617_v5, 0.0 }
 0xab1   : > { %1626 = vadd.xlane.f32.xlu1 %v1625_v53  ;;  %v1622_v7 = vsel %vm717_vm6, %v1616_v0, 0.0 }
 0xab2   : > { %1623 = vadd.xlane.f32.xlu0 %v1622_v7 }
 0xb3e   : > { %v1627_v8 = vpop.xlane.xlu1 %1626 }
 0xb3f   : > { %v1629_v9 = vmul.f32 0.03125, %v1627_v8  ;;  %v1624_v10 = vpop.xlane.xlu0 %1623 }
 0xb40   : > { %v1628_v11 = vmul.f32 0.03125, %v1624_v10 }
 0xb41   : > { %v1631_v56 = vsub.f32 %v1617_v5, %v1629_v9 }
 0xb42   : > { %v1630_v13 = vsub.f32 %v1616_v0, %v1628_v11 }
 0xb43   : > { %v1633_v20 = vmul.f32 %v1631_v56, %v1631_v56 }
 0xb44   : > { %v1632_v14 = vmul.f32 %v1630_v13, %v1630_v13 }
 0xb45   : > { %v1637_v22 = vsel %vm717_vm6, %v1633_v20, 0.0 }
 0xb46   : > { %v1634_v15 = vsel %vm717_vm6, %v1632_v14, 0.0 }
 0xb47   : > { %1635 = vadd.xlane.f32.xlu0 %v1634_v15 }
 0xb4b   : > { %1638 = vadd.xlane.f32.xlu0 %v1637_v22 }
 0xbd4   : > { %v1636_v41 = vpop.xlane.xlu0 %1635 }
 0xbd5   : > { %v1640_v42 = vmul.f32 0.03125, %v1636_v41 }
 0xbd7   : > { %v1642_v43 = vadd.f32 1e-05, %v1640_v42 }
 0xbd8   : > { %v1639_v17 = vpop.xlane.xlu0 %1638 }
 0xbd9   : > { %2724 = vrsqrt.f32 %v1642_v43  ;;  %v1641_v44 = vmul.f32 0.03125, %v1639_v17 }
 0xbdb   : > { %v1643_v16 = vadd.f32 1e-05, %v1641_v44 }
 0xbdd   : > { %2726 = vrsqrt.f32 %v1643_v16 }
 0xbe3   : > { %v2725_v46 = vpop.eup %2724 }
 0xbe4   : > { %v1646_v52 = vmul.f32 %v2725_v46, %v1630_v13 }
 0xbe6   : > { %v1654_v61 = vmul.f32 %v2246_v54, %v1646_v52 }
 0xbe7   : > { %v2727_v63 = vpop.eup %2726 }
 0xbe8   : > { %v1662_v1 = vadd.f32 %v2247_v59, %v1654_v61  ;;  %v1647_v2 = vmul.f32 %v2727_v63, %v1631_v56  ;;  %v2267_v63 = vld [vmem:[%s3640_s13 + $0x2] ss:$0 sm:$0xff] }
 0xbea   : > { %1678 = vrot.lane.b32.xlu1 %v1662_v1, %s3682_s19  ;;  %v1655_v3 = vmul.f32 %v2246_v54, %v1647_v2  ;;  %v1664_v5 = vrot.slane %v1662_v1, 7  ;;  %v1670_v0 = vrot.slane %v1662_v1, 1 }
 0xbec   : > { %v1663_v4 = vadd.f32 %v2247_v59, %v1655_v3  ;;  %v2269_v3 = vld [vmem:[%s3641_s14 + $0x2] ss:$0 sm:$0xff] }
 0xbee   : > { %1680 = vrot.lane.b32.xlu0 %v1663_v4, %s3682_s19  ;;  %v1665_v53 = vrot.slane %v1663_v4, 7  ;;  %v1671_v7 = vrot.slane %v1663_v4, 1  ;;  %s2845_s19 = smov 1  }
 0xbf0   : > { %v1672_v8 = vsel %vm696_vm1, %v1670_v0, %v1671_v7  ;;  %v1667_v9 = vsel %vm689_vm4, %v1665_v53, %v1664_v5  ;;  %v1666_v10 = vsel %vm689_vm4, %v1664_v5, %v1665_v53  ;;  %v1673_v56 = vsel %vm696_vm1, %v1671_v7, %v1670_v0 }
 0xbf1   : > { %v1674_v11 = vmul.f32 %v3072_v19, %v1672_v8  ;;  %v1675_v13 = vmul.f32 %v3079_v24, %v1673_v56  ;;  %v1668_v15 = vmul.f32 %v3105_v36, %v1667_v9  ;;  %v1669_v19 = vmul.f32 %v3111_v40, %v1666_v10  ;;  %v2261_v36 = vld [vmem:[%s3638_s11 + $0x2] ss:$0 sm:$0xff] }
 0xbf3   : > { %1686 = vrot.lane.b32.xlu1 %v1674_v11, %s3683_s25  ;;  %v1863_v11 = vstv %s2270_s1 }
 0xbf7   : > { %1688 = vrot.lane.b32.xlu1 %v1675_v13, %s3683_s25  ;;  %v1869_v13 = vstv %s2271_s23  ;;  %s2846_s25 = smov 2   ;;  %s3573_s23 = scalar_lea.hbm %s3645_s18, %s2285_s29 }
 0xc5c   : > { %v1679_v14 = vpop.permute.xlu1 %1678 }
 0xc5d   : > { %v1692_v20 = vsel %vm717_vm6, %v1668_v15, %v1679_v14 }
 0xc60   : > { %v1681_v25 = vpop.permute.xlu0 %1680 }
 0xc61   : > { %v1693_v6 = vsel %vm717_vm6, %v1669_v19, %v1681_v25 }
 0xc65   : > { %v1687_v22 = vpop.permute.xlu1 %1686 }
 0xc66   : > { %v1694_v26 = vsel %vm720_vm7, %v1692_v20, %v1687_v22 }
 0xc67   : > { %2503 = vmatprep.mubr.msk.f32.mxu0 %vm742_vm8, %v1694_v26 }
 0xc69   : > { %v1689_v27 = vpop.permute.xlu1 %1688 }
 0xc6a   : > { %v1695_v24 = vsel %vm720_vm7, %v1693_v6, %v1689_v27  ;;  %v2273_v6 = vld [vmem:[%s3642_s15 + $0x1] ss:$0 sm:$0xff] }
 0xc6b   : > { %2504 = vmatmul.mubr.msk.f32.vlgmr.msra.gmra.mrb[4].mxu0 %vm742_vm8, %v1695_v24 }
 0xd3e   : > { %v2505_v28 = vpop.f32.mrb[4].mxu0 }
 0xd3f   : > { %v1795_v30 = vadd.f32 %v2505_v28, %v2261_v36  ;;  %v1789_v32 = vpop.f32.mrb[5].mxu0  ;;  %v2207_v28 = vld [vmem:[%s3638_s11] ss:$0 sm:$0xff] }
 0xd40   : > { %v1790_v34 = vadd.f32 %v2261_v36, %v1789_v32 }
 0xd41   : > { %v1799_v35 = vmax.f32 %v1795_v30, 0.0 }
 0xd42   : > { %v1798_v38 = vmax.f32 %v1790_v34, 0.0 }
 0xd43   : > { %v1807_v40 = vsel %vm717_vm6, %v1799_v35, 0.0 }
 0xd44   : > { %1808 = vadd.xlane.f32.xlu1 %v1807_v40  ;;  %v1804_v41 = vsel %vm717_vm6, %v1798_v38, 0.0  ;;  %v1061_v40 = vadd.f32 %v2207_v28, %v3387_v33 }
 0xd45   : > { %1805 = vadd.xlane.f32.xlu0 %v1804_v41 }
 0xdd1   : > { %v1809_v42 = vpop.xlane.xlu1 %1808 }
 0xdd2   : > { %v1811_v43 = vmul.f32 0.03125, %v1809_v42  ;;  %v1806_v17 = vpop.xlane.xlu0 %1805 }
 0xdd3   : > { %v1810_v44 = vmul.f32 0.03125, %v1806_v17 }
 0xdd4   : > { %v1813_v16 = vsub.f32 %v1799_v35, %v1811_v43 }
 0xdd5   : > { %v1812_v45 = vsub.f32 %v1798_v38, %v1810_v44 }
 0xdd6   : > { %v1815_v49 = vmul.f32 %v1813_v16, %v1813_v16 }
 0xdd7   : > { %v1814_v47 = vmul.f32 %v1812_v45, %v1812_v45 }
 0xdd8   : > { %v1819_v50 = vsel %vm717_vm6, %v1815_v49, 0.0  ;;  %v2276_v49 = vld [vmem:[%s3643_s16 + $0x10] sm:$0xff] }
 0xdd9   : > { %v1816_v48 = vsel %vm717_vm6, %v1814_v47, 0.0 }
 0xdda   : > { %1817 = vadd.xlane.f32.xlu0 %v1816_v48 }
 0xdde   : > { %1820 = vadd.xlane.f32.xlu0 %v1819_v50 }
 0xe67   : > { %v1818_v51 = vpop.xlane.xlu0 %1817 }
 0xe68   : > { %v1822_v46 = vmul.f32 0.03125, %v1818_v51 }
 0xe6a   : > { %v1824_v54 = vadd.f32 1e-05, %v1822_v46 }
 0xe6b   : > { %v1821_v52 = vpop.xlane.xlu0 %1820 }
 0xe6c   : > { %2728 = vrsqrt.f32 %v1824_v54  ;;  %v1823_v57 = vmul.f32 0.03125, %v1821_v52 }
 0xe6e   : > { %v1825_v58 = vadd.f32 1e-05, %v1823_v57 }
 0xe70   : > { %2730 = vrsqrt.f32 %v1825_v58 }
 0xe76   : > { %v2729_v59 = vpop.eup %2728 }
 0xe77   : > { %v1828_v61 = vmul.f32 %v2729_v59, %v1812_v45  ;;  %v1069_v45 = vmax.f32 %v1061_v40, 0.0 }
 0xe79   : > { %v1836_v1 = vmul.f32 %v2266_v60, %v1828_v61 }
 0xe7a   : > { %v2731_v2 = vpop.eup %2730 }
 0xe7b   : > { %v1844_v4 = vadd.f32 %v2267_v63, %v1836_v1  ;;  %v1829_v5 = vmul.f32 %v2731_v2, %v1813_v16  ;;  %v1066_v16 = vadd.f32 %v3379_v29, %v2207_v28  ;;  %v2277_v29 = vld [vmem:[%s3643_s16 + $0x18] sm:$0xff] }
 0xe7c   : > { %v2637_v50 = vpack.c.bf16 %v2277_v29, %v2276_v49 }
 0xe7d   : > { %v1854_v0 = vmul.f32 %v2269_v3, %v1844_v4  ;;  %v1837_v53 = vmul.f32 %v2266_v60, %v1829_v5  ;;  %v1070_v48 = vmax.f32 %v1066_v16, 0.0 }
 0xe7e   : > { %2638 = vmatprep.subr.bf16.mxu1 %v2637_v50 }
 0xe7f   : > { %v1856_v7 = vsel %vm717_vm6, %v1854_v0, 0.0  ;;  %v1845_v8 = vadd.f32 %v2267_v63, %v1837_v53  ;;  %v1076_v33 = vsel %vm717_vm6, %v1070_v48, 0.0  ;;  %2640 = vmatpush3.bf16.msra.mxu1 %v2637_v50 }
 0xe80   : > { %1857 = vadd.xlane.f32.xlu1 %v1856_v7 }
 0xe81   : > { %v1855_v9 = vmul.f32 %v2269_v3, %v1845_v8 }
 0xe83   : > { %v1859_v10 = vsel %vm717_vm6, %v1855_v9, 0.0 }
 0xe84   : > { %1860 = vadd.xlane.f32.xlu0 %v1859_v10 }
 0xf0d   : > { %v1858_v56 = vpop.xlane.xlu1 %1857 }
 0xf0e   : > { %v1864_v14 = vadd.f32 %v1863_v11, %v1858_v56 }
 0xf10   : > { %v1866_v15 = vsel %vm644_vm9, 0.0, %v1864_v14 }
 0xf11   : > { %v3514_v20 = vmul.f32 %v1869_v13, %v1866_v15  ;;  %v1861_v22 = vpop.xlane.xlu0 %1860 }
 0xf12   : > { %v1865_v25 = vadd.f32 %v1863_v11, %v1861_v22 }
 0xf13   : > { %1876 = vperm.xlu1 %2710, %v3514_v20  }
 0xf14   : > { %v1867_v26 = vsel %vm645_vm10, 0.0, %v1865_v25 }
 0xf15   : > { %v3519_v19 = vmul.f32 %v1869_v13, %v1867_v26 }
 0xf17   : > { %1881 = vperm.xlu0 %2711, %v3519_v19  }
 0xf92   : > { %v1877_v27 = vpop.permute.xlu1 %1876 }
 0xf93   : > { %vm1890_vm1 = vcmp.gt.f32.partialorder %v1877_v27, %v2273_v6 }
 0xf94   : > { %v1892_v24 = vsel %vm1890_vm1, 1, %v2844_v12 }
 0xf95   : > { %v1894_v36 = vsel %vm1365_vm12, %v1892_v24, 0  ;;  %v2211_v24 = vld [vmem:[%s3640_s13] ss:$0 sm:$0xff] }
 0xf96   : > { %v1882_v30 = vpop.permute.xlu0 %1881  ;;  %v1896_v32 = vshrl.u32 %v1894_v36, 16  ;;  %v1895_v38 = vand.u32 65535, %v1894_v36 }
 0xf97   : > { %vm1891_vm2 = vcmp.gt.f32.partialorder %v1882_v30, %v2273_v6  ;;  %v2212_v30 = vld [vmem:[%s3641_s14] ss:$0 sm:$0xff] }
 0xf98   : > { %v1893_v34 = vsel %vm1891_vm2, 1, %v2844_v12  ;;  %v1898_v35 = vcvt.s32.f32 %v1896_v32  ;;  %v1897_v43 = vcvt.s32.f32 %v1895_v38  ;;  %v1073_v12 = vsel %vm717_vm6, %v1069_v45, 0.0 }
 0xf99   : > { %v1907_v41 = vsel %vm1365_vm12, %v1893_v34, 0 }
 0xf9a   : > { %1901 = vadd.xlane.f32.xlu1 %v1898_v35  ;;  %v1909_v42 = vshrl.u32 %v1907_v41, 16  ;;  %v1908_v44 = vand.u32 65535, %v1907_v41 }
 0xf9c   : > { %v1911_v17 = vcvt.s32.f32 %v1909_v42  ;;  %v1910_v47 = vcvt.s32.f32 %v1908_v44 }
 0xf9e   : > { %1899 = vadd.xlane.f32.xlu1 %v1897_v43  ;;  %1914 = vadd.xlane.f32.xlu0 %v1911_v17 }
 0xfa2   : > { %1912 = vadd.xlane.f32.xlu0 %v1910_v47  ;;  %1074 = vadd.xlane.f32.xlu1 %v1073_v12 }
 0xfa6   : > { %1077 = vadd.xlane.f32.xlu0 %v1076_v33 }
0x1027   : > { %v1902_v51 = vpop.xlane.xlu1 %1901 }
0x1028   : > { %v1904_v46 = vcvt.f32.s32 %v1902_v51 }
0x102a   : > { %v1905_v57 = vshll.u32 %v1904_v46, 16 }
0x102b   : > { %v1900_v54 = vpop.xlane.xlu1 %1899  ;;  %v1915_v52 = vpop.xlane.xlu0 %1914 }
0x102c   : > { %v1903_v58 = vcvt.f32.s32 %v1900_v54  ;;  %v1917_v59 = vcvt.f32.s32 %v1915_v52 }
0x102e   : > { %v1906_v60 = vadd.s32 %v1905_v57, %v1903_v58  ;;  %v1918_v1 = vshll.u32 %v1917_v59, 16 }
0x102f   : > { %v1913_v61 = vpop.xlane.xlu0 %1912  ;;  %v1075_v63 = vpop.xlane.xlu1 %1074 }
0x1030   : > { %v1916_v2 = vcvt.f32.s32 %v1913_v61  ;;  %v1079_v3 = vmul.f32 0.03125, %v1075_v63  ;;  %vm1920_vm3 = vcmp.eq.s32.totalorder %v1906_v60, %v3336_v62 }
0x1031   : > { %v2274_v4 = vsel %vm1920_vm3, 1.0, %v2841_v18 }
0x1032   : > { %v1919_v5 = vadd.s32 %v1918_v1, %v1916_v2  ;;  %v1081_v0 = vsub.f32 %v1069_v45, %v1079_v3  ;;  %2510 = vmatprep.mubr.msk.f32.mxu1 %vm1400_vm14, %v2274_v4 }
0x1033   : > { %v1078_v53 = vpop.xlane.xlu0 %1077 }
0x1034   : > { %vm1921_vm4 = vcmp.eq.s32.totalorder %v1919_v5, %v3336_v62  ;;  %v1080_v7 = vmul.f32 0.03125, %v1078_v53  ;;  %v1083_v8 = vmul.f32 %v1081_v0, %v1081_v0 }
0x1035   : > { %v2275_v9 = vsel %vm1921_vm4, 1.0, %v2841_v18  ;;  %v2210_v18 = vld [vmem:[%s3639_s12] ss:$0 sm:$0xff] }
0x1036   : > { %v1082_v10 = vsub.f32 %v1070_v48, %v1080_v7  ;;  %2511 = vmatmul.mubr.msk.f32.vlgmr.msra.gmra.mrb[6].mxu1 %vm1400_vm14, %v2275_v9  ;;  %v1085_v11 = vsel %vm717_vm6, %v1083_v8, 0.0 }
0x1037   : > { %1086 = vadd.xlane.f32.xlu1 %v1085_v11 }
0x1038   : > { %v1084_v56 = vmul.f32 %v1082_v10, %v1082_v10 }
0x103a   : > { %v1088_v13 = vsel %vm717_vm6, %v1084_v56, 0.0 }
0x103b   : > { %1089 = vadd.xlane.f32.xlu0 %v1088_v13 }
0x10c4   : > { %v1087_v14 = vpop.xlane.xlu1 %1086 }
0x10c5   : > { %v1091_v15 = vmul.f32 0.03125, %v1087_v14 }
0x10c7   : > { %v1093_v22 = vadd.f32 1e-05, %v1091_v15 }
0x10c8   : > { %v1090_v25 = vpop.xlane.xlu0 %1089 }
0x10c9   : > { %2732 = vrsqrt.f32 %v1093_v22  ;;  %v1092_v62 = vmul.f32 0.03125, %v1090_v25 }
0x10cb   : > { %v1094_v26 = vadd.f32 1e-05, %v1092_v62 }
0x10cd   : > { %2734 = vrsqrt.f32 %v1094_v26 }
0x10d3   : > { %v2733_v6 = vpop.eup %2732 }
0x10d4   : > { %v1097_v27 = vmul.f32 %v2733_v6, %v1081_v0 }
0x10d6   : > { %v1105_v36 = vmul.f32 %v2210_v18, %v1097_v27 }
0x10d7   : > { %v2735_v28 = vpop.eup %2734 }
0x10d8   : > { %v1113_v32 = vadd.f32 %v2211_v24, %v1105_v36  ;;  %v1098_v34 = vmul.f32 %v2735_v28, %v1082_v10 }
0x10da   : > { %v1122_v35 = vmul.f32 %v2212_v30, %v1113_v32  ;;  %v1106_v38 = vmul.f32 %v2210_v18, %v1098_v34 }
0x10dc   : > { %v1124_v40 = vsel %vm717_vm6, %v1122_v35, 0.0  ;;  %v1114_v41 = vadd.f32 %v2211_v24, %v1106_v38 }
0x10dd   : > { %1125 = vadd.xlane.f32.xlu1 %v1124_v40 }
0x10de   : > { %v1123_v42 = vmul.f32 %v2212_v30, %v1114_v41 }
0x10e0   : > { %v1127_v43 = vsel %vm717_vm6, %v1123_v42, 0.0 }
0x10e1   : > { %1128 = vadd.xlane.f32.xlu0 %v1127_v43 }
0x10ee   : > { %2012 = vrot.lane.b32.xlu1 %v3246_v23, %s2845_s19 }
0x10f2   : > { %2018 = vrot.lane.b32.xlu1 %v3514_v20, %s2846_s25 }
0x10f6   : > { %2020 = vrot.lane.b32.xlu1 %v3519_v19, %s2846_s25 }
0x10f7   : > { %2014 = vrot.lane.b32.xlu0 %v3252_v31, %s2845_s19  ;;  %s2770_s19 = sshll.u32 %s2847_s3, 4  ;;  %s2771_s19 = int_to_ptr.vmem [resolvable:$false] %s2770_s19 }
0x10f8   : > { %s2772_s25 = scalar_lea.vmem %s2771_s19, 512  ;;  %p2773_p8 = scmp.lt.s32.totalorder %s3568_s27, %s2771_s19 }
0x10f9   : > { %p2774_p11 = scmp.lt.s32.totalorder %s2772_s25, %s2766_s26 }
0x10fb   : > { %p2775_p13 = por %p2774_p11, %p2773_p8 }
0x10fd   : > { %p2776_p1 = pnand %p2775_p13, %p2769_p7 }
0x1109   : > { %v2512_v17 = vpop.f32.mrb[6].mxu1 }
0x110a   : > { %v2011_v44 = vadd.f32 %v2512_v17, %v3390_v37  ;;  %v2001_v23 = vpop.f32.mrb[7].mxu1 }
0x110b   : > { %v2010_v31 = vadd.f32 %v2001_v23, %v3393_v39 }
0x110c   : > { %2034 = vst.msk [vmem:[%s620_s4 + $0x8] sm:$0xff] %vm717_vm6, %v2011_v44 }
0x110d   : > { %2033 = vst.msk [vmem:[%s620_s4] sm:$0xff] %vm717_vm6, %v2010_v31 }
0x110e   : > { %2779 = shalt.err (!%p2776_p1)
}
0x110f   : > { %s2780_s21 = scalar_lea.hbm %s3573_s23, 256  ;;  %s2784_s29 = scalar_lea.hbm %s3645_s18, 512 }
0x1110   : > { %p2781_p2 = scmp.ne.s32.totalorder %s3573_s23, %s2780_s21  ;;  %p2785_p9 = scmp.lt.u32.totalorder %s3573_s23, %s3645_s18 }
0x1111   : > { %p2786_p5 = scmp.lt.u32.totalorder %s2784_s29, %s2780_s21  ;;  %p2788_p10 = scmp.lt.u32.totalorder %s2780_s21, %s3573_s23 }
0x1112   : > { %p2782_p3 = pnand %p2781_p2, %p3684_p12 }
0x1113   : > { %p2787_p6 = por %p2786_p5, %p2785_p9 }
0x1114   : > { %p2783_p4 = pneg %p2782_p3 }
0x1115   : > { %p2789_p0 = por %p2788_p10, %p2787_p6 }
0x1117   : > { %p2790_p7 = pnand %p2789_p0, %p2783_p4 }
0x1119   : > { %2793 = shalt.err (!%p2790_p7)
}
0x111a   : > { %s2848_s26 = smov 128   ;;  %s2849_s3 = smov 8   ;;  %vm2024_vm5 = vcmask 7168   ;;  %vm2027_vm6 = vcmask 15360   ;;  %vm2030_vm7 = vcmask 23552  }
0x111b   : > { %2649 = dma.vmem_to_hbm [thread:$0]  (%p3684_p12), %s3568_s27, 256, %s3573_s23, %s3578_s0, %s2848_s26, %s2848_s26, %s2849_s3  }
0x111c   : > { %s1130_s19 = sld [smem:[#allocation5]]  ;;  %s637_s20 = scalar_lea.vmem %s3644_s17, %s3052_s24 }
0x1122   : > { %v1131_v37 = vstv %s1130_s19 }
0x116a   : > { %v1126_v39 = vpop.xlane.xlu1 %1125 }
0x116b   : > { %v1132_v20 = vadd.f32 %v1131_v37, %v1126_v39 }
0x116d   : > { %v1134_v45 = vsel %vm644_vm9, 0.0, %v1132_v20 }
0x116e   : > { %v1129_v19 = vpop.xlane.xlu0 %1128  ;;  %v2013_v16 = vpop.permute.xlu1 %2012 }
0x116f   : > { %v1133_v47 = vadd.f32 %v1131_v37, %v1129_v19  ;;  %v2025_v48 = vsel %vm2024_vm5, %v1134_v45, %v2013_v16 }
0x1171   : > { %v1135_v33 = vsel %vm645_vm10, 0.0, %v1133_v47 }
0x1172   : > { %v2019_v12 = vpop.permute.xlu1 %2018  ;;  %v2015_v49 = vpop.permute.xlu0 %2014 }
0x1173   : > { %v2028_v29 = vsel %vm2027_vm6, %v2025_v48, %v2019_v12  ;;  %v2026_v50 = vsel %vm2024_vm5, %v1135_v33, %v2015_v49 }
0x1174   : > { %2031 = vst.msk [vmem:[%s637_s20] sm:$0xff] %vm2030_vm7, %v2028_v29 }
0x1176   : > { %v2021_v51 = vpop.permute.xlu1 %2020 }
0x1177   : > { %v2029_v55 = vsel %vm2027_vm6, %v2026_v50, %v2021_v51 }
0x1178   : > { %2032 = vst.msk [vmem:[%s637_s20 + $0x8] sm:$0xff] %vm2030_vm7, %v2029_v55 }
0x1179 PF: > { %s3685_s2 = sld [smem:[#allocation11_spill]]  ;;  %s3686_s27 = sld [smem:[#allocation15_spill]] }
0x117a   : > { %p2666_p12 = scmp.ge.s32.totalorder %s2836_s30, 2 }
0x117f   : > { %s2081_s23 = sand.u32 1, %s3685_s2   ;;  %p3687_p8 = scmp.ne.s32.totalorder %s3686_s27, 0 }
0x1180   : > { %s2082_s24 = scalar_lea.sflag [#allocation3], %s2081_s23 }
0x1181   : > { %p2659_p11 = pnand %p2666_p12, %p3687_p8 }
0x1183   : > { %2819 = dma.done.wait (!%p2659_p11), %s2082_s24, 256  }
0x1184   : > { %2821 = vsyncadd (!%p2659_p11), %s2082_s24, 4294967040  ;;  %s3688_s30 = sld [smem:[#allocation13_spill]]  ;;  %s3689_s0 = sld [smem:[#allocation12_spill]] }
0x1185   : > { %s3690_s29 = sld [smem:[#allocation14_spill]]  ;;  %s3691_s27 = smov %s2828_s28 }
0x118a   : > { %p31_p13 = scmp.ge.s32.totalorder %s3688_s30, 4   ;;  %s3692_s28 = smov %s3689_s0 }
0x118c   :  { %33 = sbr.rel (!%p31_p13) target bundleno = 11 (0xb), region = 163 }
0x1193   :  { %2087 = vsyncpa [#allocation3], 1 }
0x1194   :  { %2089 = vsyncpa [#allocation3 + $0x1], 1 }
0x1195   :  { %2090 = vsyncpa [#allocation4], 1 }
0x1196   :  { %2092 = vsyncpa [#allocation4 + $0x1], 1 }
0x1197   :  { %2093 = vsyncpa [#allocation6], 1 }

</bundles_post_ra>
